<compile_context>
chip_gen: v7x
topology: tpu7x:2x2x1
jax: 0.10.0
libtpu: 0.0.40
codegen_flags: <defaults>
</compile_context>

<pallas_src>
import math
import numpy as np
import jax
import jax.numpy as jnp
from jax import lax
from jax.experimental import pallas as pl
from jax.experimental.pallas import tpu as pltpu

# ----------------------------- configuration --------------------------------
B_DIM, C_DIM = 2, 4          # b, c
N_SEQ = 8                    # n (tokens / patches attended over)
D_MODEL = 32                 # d_model
D_FF = 4 * D_MODEL           # d_ff (default 4 * d_model)
N_HEADS = 4
D_HEAD = D_MODEL // N_HEADS
PERIOD = 6                   # PeriodNorm window used in temporal_attn
LN_EPS = 1e-5
NEG_INF = -1e30              # additive mask value (finite to avoid nan corner cases)


# ------------------------------- the kernel ---------------------------------
def t_layer_kernel(x_ref, wqkv_ref, bqkv_ref, bias_ref, wo_ref, bo_ref,
                   g1_ref, be1_ref, w1_ref, b1_ref, w2_ref, b2_ref,
                   g2_ref, be2_ref, o_ref, heads_ref):
    x2 = x_ref[...]                                   # (R, d), R = b*c*n

    # ---- fused (PeriodNorm + 1/sqrt(dh) + Q|K|V) projection: one MXU push ----
    qkv = jnp.dot(x2, wqkv_ref[...],
                  preferred_element_type=jnp.float32) + bqkv_ref[...]   # (R, 4d)
    bias = bias_ref[...]                              # (R, R) block-diag additive mask

    # ---- attention: per head, two full-width matmuls over the flattened batch
    for h in range(N_HEADS):                          # static unroll over 4 heads
        lo = h * D_HEAD
        qh = qkv[:, lo:lo + D_HEAD]                               # (R, dh), scale folded
        kh = qkv[:, D_MODEL + lo:D_MODEL + lo + D_HEAD]           # (R, dh)
        vh = qkv[:, 2 * D_MODEL + lo:2 * D_MODEL + lo + D_HEAD]   # (R, dh)

        # whole-batch scores (R, R); cross-batch entries killed by the mask
        s = lax.dot_general(qh, kh, (((1,), (1,)), ((), ())),
                            preferred_element_type=jnp.float32) + bias
        s = s - jnp.max(s, axis=-1, keepdims=True)
        p = jnp.exp(s)
        p = p / jnp.sum(p, axis=-1, keepdims=True)    # exact softmax (no approx recip)

        # head output lands in its natural 8-lane slot of the (R, d) scratch
        heads_ref[:, lo:lo + D_HEAD] = jnp.dot(p, vh,
                                               preferred_element_type=jnp.float32)

    # ---- single output projection over all heads -----------------------------
    new_x = jnp.dot(heads_ref[...], wo_ref[...],
                    preferred_element_type=jnp.float32) + bo_ref[...]

    # ---- residual + LayerNorm1 (dropout == identity in eval) ----------------
    x1 = x2 + new_x
    mu1 = jnp.mean(x1, axis=-1, keepdims=True)
    var1 = jnp.mean((x1 - mu1) ** 2, axis=-1, keepdims=True)
    xn = (x1 - mu1) * lax.rsqrt(var1 + LN_EPS) * g1_ref[...] + be1_ref[...]

    # ---- feed-forward --------------------------------------------------------
    y = jnp.dot(xn, w1_ref[...], preferred_element_type=jnp.float32) + b1_ref[...]
    y = jnp.maximum(y, 0.0)                           # relu
    y = jnp.dot(y, w2_ref[...], preferred_element_type=jnp.float32) + b2_ref[...]

    # ---- residual + LayerNorm2 ----------------------------------------------
    z = xn + y
    mu2 = jnp.mean(z, axis=-1, keepdims=True)
    var2 = jnp.mean((z - mu2) ** 2, axis=-1, keepdims=True)
    out = (z - mu2) * lax.rsqrt(var2 + LN_EPS) * g2_ref[...] + be2_ref[...]

    o_ref[...] = out.astype(o_ref.dtype)              # one contiguous (R, d) store


# ------------------------------- host-side helpers ---------------------------
def _rolling_mean_matrix(d, period):
    """M_T[j, k] = weight of x[:, j] in mean[:, k] (causal window, replicate pad),
    so that mean = x @ M_T.  Matches PyTorch PeriodNorm(x, period) on the last axis."""
    m = np.zeros((d, d), np.float32)
    for kk in range(d):
        if kk < period - 1:
            lo, hi = 0, period          # replicate-padded region: first full window
        else:
            lo, hi = kk - period + 1, kk + 1
        m[kk, lo:hi] = 1.0 / period
    return jnp.asarray(m.T)             # (d, d)


def _fold_params(params, d):
    """Fold PeriodNorm and the attention scale into a fused (d, 4d) QKV weight.
    Scale is applied ONLY to the Q columns (and bq)."""
    scale = 1.0 / math.sqrt(D_HEAD)
    A = jnp.eye(d, dtype=jnp.float32) - params["mt"]          # qk_in = x @ A
    wq = (A @ params["wq"]) * scale
    bq = params["bq"] * scale
    wk = A @ params["wk"]
    pad_w = jnp.zeros((d, d), jnp.float32)                    # pad to 128 lanes
    pad_b = jnp.zeros((1, d), jnp.float32)
    wqkv = jnp.concatenate([wq, wk, params["wv"], pad_w], axis=1)            # (d, 4d)
    bqkv = jnp.concatenate([bq, params["bk"], params["bv"], pad_b], axis=1)  # (1, 4d)
    return wqkv, bqkv


def _block_diag_bias(rows, n):
    """(R, R) additive mask: 0 within a batch's own n x n block, -1e30 elsewhere."""
    blk = np.arange(rows) // n
    m = np.where(blk[:, None] == blk[None, :], 0.0, NEG_INF).astype(np.float32)
    return jnp.asarray(m)


# ------------------------------- wrapper -------------------------------------
def t_layer_forward(x, params):
    b, c, n, d = x.shape
    assert d == D_MODEL and n == N_SEQ
    R = b * c * n
    xf = x.reshape(R, d).astype(jnp.float32)

    wqkv, bqkv = _fold_params(params, d)
    bias = _block_diag_bias(R, n)
    # TODO(synk): for much larger b*c, tile rows (multiple-of-n blocks) so the
    # per-block (RB, RB) mask and activation slabs stay within v7x's 64 MiB VMEM.

    weights = [wqkv, bqkv, bias, params["wo"], params["bo"],
               params["g1"], params["be1"],
               params["w1"], params["b1"], params["w2"], params["b2"],
               params["g2"], params["be2"]]

    in_specs = [pl.BlockSpec((R, d), lambda i: (0, 0))]
    in_specs += [pl.BlockSpec(w.shape, lambda i: (0, 0)) for w in weights]

    out = pl.pallas_call(
        t_layer_kernel,
        out_shape=jax.ShapeDtypeStruct((R, d), jnp.float32),
        grid=(1,),                     # whole problem in a single step (per review)
        in_specs=in_specs,
        out_specs=pl.BlockSpec((R, d), lambda i: (0, 0)),
        scratch_shapes=[pltpu.VMEM((R, D_MODEL), jnp.float32)],   # head-concat buffer
        compiler_params=pltpu.CompilerParams(dimension_semantics=("arbitrary",)),
    )(xf, *weights)

    return out.reshape(b, c, n, d)


# --------------------------- pure-JAX reference -------------------------------
def t_layer_reference(x, params):
    b, c, n, d = x.shape
    xf = x.reshape(b * c, n, d).astype(jnp.float32)
    mean = jnp.einsum('bnd,de->bne', xf, params["mt"])
    qk = xf - mean
    q = qk @ params["wq"] + params["bq"]
    k = qk @ params["wk"] + params["bk"]
    v = xf @ params["wv"] + params["bv"]
    qh = q.reshape(-1, n, N_HEADS, D_HEAD)
    kh = k.reshape(-1, n, N_HEADS, D_HEAD)
    vh = v.reshape(-1, n, N_HEADS, D_HEAD)
    s = jnp.einsum('bnhd,bmhd->bhnm', qh, kh) / math.sqrt(D_HEAD)
    p = jax.nn.softmax(s, axis=-1)
    a = jnp.einsum('bhnm,bmhd->bnhd', p, vh).reshape(-1, n, d)
    new_x = a @ params["wo"] + params["bo"]

    def ln(u, g, be):
        mu = jnp.mean(u, axis=-1, keepdims=True)
        var = jnp.mean((u - mu) ** 2, axis=-1, keepdims=True)
        return (u - mu) * lax.rsqrt(var + LN_EPS) * g + be

    x1 = ln(xf + new_x, params["g1"], params["be1"])
    y = jnp.maximum(x1 @ params["w1"] + params["b1"], 0.0)
    y = y @ params["w2"] + params["b2"]
    return ln(x1 + y, params["g2"], params["be2"]).reshape(b, c, n, d)


# ----------------------------------- main -------------------------------------
if __name__ == "__main__":
    key = jax.random.PRNGKey(0)
    keys = jax.random.split(key, 20)

    def w(k, shape, scale=0.05):
        return (scale * jax.random.normal(k, shape)).astype(jnp.float32)

    params = {
        "mt": _rolling_mean_matrix(D_MODEL, PERIOD),
        "wq": w(keys[0], (D_MODEL, D_MODEL)), "bq": w(keys[1], (1, D_MODEL)),
        "wk": w(keys[2], (D_MODEL, D_MODEL)), "bk": w(keys[3], (1, D_MODEL)),
        "wv": w(keys[4], (D_MODEL, D_MODEL)), "bv": w(keys[5], (1, D_MODEL)),
        "wo": w(keys[6], (D_MODEL, D_MODEL)), "bo": w(keys[7], (1, D_MODEL)),
        "g1": 1.0 + w(keys[8], (1, D_MODEL)), "be1": w(keys[9], (1, D_MODEL)),
        "w1": w(keys[10], (D_MODEL, D_FF)),   "b1": w(keys[11], (1, D_FF)),
        "w2": w(keys[12], (D_FF, D_MODEL)),   "b2": w(keys[13], (1, D_MODEL)),
        "g2": 1.0 + w(keys[14], (1, D_MODEL)), "be2": w(keys[15], (1, D_MODEL)),
    }

    x = jax.random.normal(keys[16], (B_DIM, C_DIM, N_SEQ, D_MODEL), jnp.float32)

    out = jax.block_until_ready(t_layer_forward(x, params))
    ref = jax.block_until_ready(t_layer_reference(x, params))
    np.testing.assert_allclose(np.asarray(out), np.asarray(ref), rtol=2e-3, atol=2e-3)

    # TODO(synk): dropout is treated as identity (eval/inference mode); training-mode
    # stochastic dropout is not implemented in the kernel.
    print("KERNEL_OK")
</pallas_src>

<mosaic_0001>
module attributes {stable_mosaic.version = 11 : i64} {
  func.func @t_layer_kernel(%arg0: i32, %arg1: memref<64x32xf32, #tpu.memory_space<vmem>>, %arg2: memref<32x128xf32, #tpu.memory_space<vmem>>, %arg3: memref<1x128xf32, #tpu.memory_space<vmem>>, %arg4: memref<64x64xf32, #tpu.memory_space<vmem>>, %arg5: memref<32x32xf32, #tpu.memory_space<vmem>>, %arg6: memref<1x32xf32, #tpu.memory_space<vmem>>, %arg7: memref<1x32xf32, #tpu.memory_space<vmem>>, %arg8: memref<1x32xf32, #tpu.memory_space<vmem>>, %arg9: memref<32x128xf32, #tpu.memory_space<vmem>>, %arg10: memref<1x128xf32, #tpu.memory_space<vmem>>, %arg11: memref<128x32xf32, #tpu.memory_space<vmem>>, %arg12: memref<1x32xf32, #tpu.memory_space<vmem>>, %arg13: memref<1x32xf32, #tpu.memory_space<vmem>>, %arg14: memref<1x32xf32, #tpu.memory_space<vmem>>, %arg15: memref<64x32xf32, #tpu.memory_space<vmem>>, %arg16: memref<64x32xf32, #tpu.memory_space<vmem>>) attributes {dimension_semantics = [#tpu.dimension_semantics<arbitrary>], iteration_bounds = array<i64: 1>, scalar_prefetch = 0 : i64, scratch_operands = 1 : i64, tpu.core_type = #tpu.core_type<tc>, window_params = [{pipeline_mode = #tpu.pipeline_mode<synchronous>, transform_indices = @transform_0, window_bounds = array<i64: 64, 32>}, {pipeline_mode = #tpu.pipeline_mode<synchronous>, transform_indices = @transform_1, window_bounds = array<i64: 32, 128>}, {pipeline_mode = #tpu.pipeline_mode<synchronous>, transform_indices = @transform_2, window_bounds = array<i64: 1, 128>}, {pipeline_mode = #tpu.pipeline_mode<synchronous>, transform_indices = @transform_3, window_bounds = array<i64: 64, 64>}, {pipeline_mode = #tpu.pipeline_mode<synchronous>, transform_indices = @transform_4, window_bounds = array<i64: 32, 32>}, {pipeline_mode = #tpu.pipeline_mode<synchronous>, transform_indices = @transform_5, window_bounds = array<i64: 1, 32>}, {pipeline_mode = #tpu.pipeline_mode<synchronous>, transform_indices = @transform_6, window_bounds = array<i64: 1, 32>}, {pipeline_mode = #tpu.pipeline_mode<synchronous>, transform_indices = @transform_7, window_bounds = array<i64: 1, 32>}, {pipeline_mode = #tpu.pipeline_mode<synchronous>, transform_indices = @transform_8, window_bounds = array<i64: 32, 128>}, {pipeline_mode = #tpu.pipeline_mode<synchronous>, transform_indices = @transform_9, window_bounds = array<i64: 1, 128>}, {pipeline_mode = #tpu.pipeline_mode<synchronous>, transform_indices = @transform_10, window_bounds = array<i64: 128, 32>}, {pipeline_mode = #tpu.pipeline_mode<synchronous>, transform_indices = @transform_11, window_bounds = array<i64: 1, 32>}, {pipeline_mode = #tpu.pipeline_mode<synchronous>, transform_indices = @transform_12, window_bounds = array<i64: 1, 32>}, {pipeline_mode = #tpu.pipeline_mode<synchronous>, transform_indices = @transform_13, window_bounds = array<i64: 1, 32>}, {pipeline_mode = #tpu.pipeline_mode<synchronous>, transform_indices = @transform_14, window_bounds = array<i64: 64, 32>}]} {
    %c0 = arith.constant 0 : index
    %c0_0 = arith.constant 0 : index
    %0 = vector.load %arg1[%c0, %c0_0] : memref<64x32xf32, #tpu.memory_space<vmem>>, vector<64x32xf32>
    %c0_1 = arith.constant 0 : index
    %c0_2 = arith.constant 0 : index
    %1 = vector.load %arg2[%c0_1, %c0_2] : memref<32x128xf32, #tpu.memory_space<vmem>>, vector<32x128xf32>
    %cst = arith.constant dense<0.000000e+00> : vector<64x128xf32>
    %2 = tpu.matmul %0, %1, %cst {dimension_numbers = #tpu.dot_dimension_numbers<[1], [0], [0], [1], [0, 0, 1, 1], [], []>} : vector<64x32xf32>, vector<32x128xf32>, vector<64x128xf32> -> vector<64x128xf32>
    %c0_3 = arith.constant 0 : index
    %c0_4 = arith.constant 0 : index
    %3 = vector.load %arg3[%c0_3, %c0_4] : memref<1x128xf32, #tpu.memory_space<vmem>>, vector<1x128xf32>
    %4 = vector.broadcast %3 : vector<1x128xf32> to vector<64x128xf32>
    %5 = arith.addf %2, %4 : vector<64x128xf32>
    %c0_5 = arith.constant 0 : index
    %c0_6 = arith.constant 0 : index
    %6 = vector.load %arg4[%c0_5, %c0_6] : memref<64x64xf32, #tpu.memory_space<vmem>>, vector<64x64xf32>
    %7 = vector.extract_strided_slice %5 {offsets = [0, 0], sizes = [64, 8], strides = [1, 1]} : vector<64x128xf32> to vector<64x8xf32>
    %8 = vector.extract_strided_slice %5 {offsets = [0, 32], sizes = [64, 8], strides = [1, 1]} : vector<64x128xf32> to vector<64x8xf32>
    %9 = vector.extract_strided_slice %5 {offsets = [0, 64], sizes = [64, 8], strides = [1, 1]} : vector<64x128xf32> to vector<64x8xf32>
    %cst_7 = arith.constant dense<0.000000e+00> : vector<64x64xf32>
    %10 = tpu.matmul %7, %8, %cst_7 {dimension_numbers = #tpu.dot_dimension_numbers<[1], [1], [0], [0], [0, 0, 1, 0], [], []>} : vector<64x8xf32>, vector<64x8xf32>, vector<64x64xf32> -> vector<64x64xf32>
    %11 = arith.addf %10, %6 : vector<64x64xf32>
    %cst_8 = arith.constant dense<0xFF800000> : vector<64xf32>
    %12 = vector.multi_reduction <maximumf>, %11, %cst_8 [1] : vector<64x64xf32> to vector<64xf32>
    %13 = vector.shape_cast %12 : vector<64xf32> to vector<64x1xf32>
    %14 = vector.broadcast %13 : vector<64x1xf32> to vector<64x64xf32>
    %15 = arith.subf %11, %14 : vector<64x64xf32>
    %16 = math.exp %15 : vector<64x64xf32>
    %cst_9 = arith.constant dense<0.000000e+00> : vector<64xf32>
    %17 = vector.multi_reduction <add>, %16, %cst_9 [1] : vector<64x64xf32> to vector<64xf32>
    %18 = vector.shape_cast %17 : vector<64xf32> to vector<64x1xf32>
    %19 = vector.broadcast %18 : vector<64x1xf32> to vector<64x64xf32>
    %20 = arith.divf %16, %19 : vector<64x64xf32>
    %cst_10 = arith.constant dense<0.000000e+00> : vector<64x8xf32>
    %21 = tpu.matmul %20, %9, %cst_10 {dimension_numbers = #tpu.dot_dimension_numbers<[1], [0], [0], [1], [0, 0, 1, 1], [], []>} : vector<64x64xf32>, vector<64x8xf32>, vector<64x8xf32> -> vector<64x8xf32>
    %c0_11 = arith.constant 0 : index
    %c0_12 = arith.constant 0 : index
    %22 = vector.load %arg16[%c0_11, %c0_12] : memref<64x32xf32, #tpu.memory_space<vmem>>, vector<64x8xf32>
    tpu.vector_store %arg16[%c0_11, %c0_12], %21 {strides = array<i32>} : memref<64x32xf32, #tpu.memory_space<vmem>>, vector<64x8xf32>,
    %23 = vector.extract_strided_slice %5 {offsets = [0, 8], sizes = [64, 8], strides = [1, 1]} : vector<64x128xf32> to vector<64x8xf32>
    %24 = vector.extract_strided_slice %5 {offsets = [0, 40], sizes = [64, 8], strides = [1, 1]} : vector<64x128xf32> to vector<64x8xf32>
    %25 = vector.extract_strided_slice %5 {offsets = [0, 72], sizes = [64, 8], strides = [1, 1]} : vector<64x128xf32> to vector<64x8xf32>
    %cst_13 = arith.constant dense<0.000000e+00> : vector<64x64xf32>
    %26 = tpu.matmul %23, %24, %cst_13 {dimension_numbers = #tpu.dot_dimension_numbers<[1], [1], [0], [0], [0, 0, 1, 0], [], []>} : vector<64x8xf32>, vector<64x8xf32>, vector<64x64xf32> -> vector<64x64xf32>
    %27 = arith.addf %26, %6 : vector<64x64xf32>
    %cst_14 = arith.constant dense<0xFF800000> : vector<64xf32>
    %28 = vector.multi_reduction <maximumf>, %27, %cst_14 [1] : vector<64x64xf32> to vector<64xf32>
    %29 = vector.shape_cast %28 : vector<64xf32> to vector<64x1xf32>
    %30 = vector.broadcast %29 : vector<64x1xf32> to vector<64x64xf32>
    %31 = arith.subf %27, %30 : vector<64x64xf32>
    %32 = math.exp %31 : vector<64x64xf32>
    %cst_15 = arith.constant dense<0.000000e+00> : vector<64xf32>
    %33 = vector.multi_reduction <add>, %32, %cst_15 [1] : vector<64x64xf32> to vector<64xf32>
    %34 = vector.shape_cast %33 : vector<64xf32> to vector<64x1xf32>
    %35 = vector.broadcast %34 : vector<64x1xf32> to vector<64x64xf32>
    %36 = arith.divf %32, %35 : vector<64x64xf32>
    %cst_16 = arith.constant dense<0.000000e+00> : vector<64x8xf32>
    %37 = tpu.matmul %36, %25, %cst_16 {dimension_numbers = #tpu.dot_dimension_numbers<[1], [0], [0], [1], [0, 0, 1, 1], [], []>} : vector<64x64xf32>, vector<64x8xf32>, vector<64x8xf32> -> vector<64x8xf32>
    %c0_17 = arith.constant 0 : index
    %c8 = arith.constant 8 : index
    %38 = vector.load %arg16[%c0_17, %c8] : memref<64x32xf32, #tpu.memory_space<vmem>>, vector<64x8xf32>
    tpu.vector_store %arg16[%c0_17, %c8], %37 {strides = array<i32>} : memref<64x32xf32, #tpu.memory_space<vmem>>, vector<64x8xf32>,
    %39 = vector.extract_strided_slice %5 {offsets = [0, 16], sizes = [64, 8], strides = [1, 1]} : vector<64x128xf32> to vector<64x8xf32>
    %40 = vector.extract_strided_slice %5 {offsets = [0, 48], sizes = [64, 8], strides = [1, 1]} : vector<64x128xf32> to vector<64x8xf32>
    %41 = vector.extract_strided_slice %5 {offsets = [0, 80], sizes = [64, 8], strides = [1, 1]} : vector<64x128xf32> to vector<64x8xf32>
    %cst_18 = arith.constant dense<0.000000e+00> : vector<64x64xf32>
    %42 = tpu.matmul %39, %40, %cst_18 {dimension_numbers = #tpu.dot_dimension_numbers<[1], [1], [0], [0], [0, 0, 1, 0], [], []>} : vector<64x8xf32>, vector<64x8xf32>, vector<64x64xf32> -> vector<64x64xf32>
    %43 = arith.addf %42, %6 : vector<64x64xf32>
    %cst_19 = arith.constant dense<0xFF800000> : vector<64xf32>
    %44 = vector.multi_reduction <maximumf>, %43, %cst_19 [1] : vector<64x64xf32> to vector<64xf32>
    %45 = vector.shape_cast %44 : vector<64xf32> to vector<64x1xf32>
    %46 = vector.broadcast %45 : vector<64x1xf32> to vector<64x64xf32>
    %47 = arith.subf %43, %46 : vector<64x64xf32>
    %48 = math.exp %47 : vector<64x64xf32>
    %cst_20 = arith.constant dense<0.000000e+00> : vector<64xf32>
    %49 = vector.multi_reduction <add>, %48, %cst_20 [1] : vector<64x64xf32> to vector<64xf32>
    %50 = vector.shape_cast %49 : vector<64xf32> to vector<64x1xf32>
    %51 = vector.broadcast %50 : vector<64x1xf32> to vector<64x64xf32>
    %52 = arith.divf %48, %51 : vector<64x64xf32>
    %cst_21 = arith.constant dense<0.000000e+00> : vector<64x8xf32>
    %53 = tpu.matmul %52, %41, %cst_21 {dimension_numbers = #tpu.dot_dimension_numbers<[1], [0], [0], [1], [0, 0, 1, 1], [], []>} : vector<64x64xf32>, vector<64x8xf32>, vector<64x8xf32> -> vector<64x8xf32>
    %c0_22 = arith.constant 0 : index
    %c16 = arith.constant 16 : index
    %54 = vector.load %arg16[%c0_22, %c16] : memref<64x32xf32, #tpu.memory_space<vmem>>, vector<64x8xf32>
    tpu.vector_store %arg16[%c0_22, %c16], %53 {strides = array<i32>} : memref<64x32xf32, #tpu.memory_space<vmem>>, vector<64x8xf32>,
    %55 = vector.extract_strided_slice %5 {offsets = [0, 24], sizes = [64, 8], strides = [1, 1]} : vector<64x128xf32> to vector<64x8xf32>
    %56 = vector.extract_strided_slice %5 {offsets = [0, 56], sizes = [64, 8], strides = [1, 1]} : vector<64x128xf32> to vector<64x8xf32>
    %57 = vector.extract_strided_slice %5 {offsets = [0, 88], sizes = [64, 8], strides = [1, 1]} : vector<64x128xf32> to vector<64x8xf32>
    %cst_23 = arith.constant dense<0.000000e+00> : vector<64x64xf32>
    %58 = tpu.matmul %55, %56, %cst_23 {dimension_numbers = #tpu.dot_dimension_numbers<[1], [1], [0], [0], [0, 0, 1, 0], [], []>} : vector<64x8xf32>, vector<64x8xf32>, vector<64x64xf32> -> vector<64x64xf32>
    %59 = arith.addf %58, %6 : vector<64x64xf32>
    %cst_24 = arith.constant dense<0xFF800000> : vector<64xf32>
    %60 = vector.multi_reduction <maximumf>, %59, %cst_24 [1] : vector<64x64xf32> to vector<64xf32>
    %61 = vector.shape_cast %60 : vector<64xf32> to vector<64x1xf32>
    %62 = vector.broadcast %61 : vector<64x1xf32> to vector<64x64xf32>
    %63 = arith.subf %59, %62 : vector<64x64xf32>
    %64 = math.exp %63 : vector<64x64xf32>
    %cst_25 = arith.constant dense<0.000000e+00> : vector<64xf32>
    %65 = vector.multi_reduction <add>, %64, %cst_25 [1] : vector<64x64xf32> to vector<64xf32>
    %66 = vector.shape_cast %65 : vector<64xf32> to vector<64x1xf32>
    %67 = vector.broadcast %66 : vector<64x1xf32> to vector<64x64xf32>
    %68 = arith.divf %64, %67 : vector<64x64xf32>
    %cst_26 = arith.constant dense<0.000000e+00> : vector<64x8xf32>
    %69 = tpu.matmul %68, %57, %cst_26 {dimension_numbers = #tpu.dot_dimension_numbers<[1], [0], [0], [1], [0, 0, 1, 1], [], []>} : vector<64x64xf32>, vector<64x8xf32>, vector<64x8xf32> -> vector<64x8xf32>
    %c0_27 = arith.constant 0 : index
    %c24 = arith.constant 24 : index
    %70 = vector.load %arg16[%c0_27, %c24] : memref<64x32xf32, #tpu.memory_space<vmem>>, vector<64x8xf32>
    tpu.vector_store %arg16[%c0_27, %c24], %69 {strides = array<i32>} : memref<64x32xf32, #tpu.memory_space<vmem>>, vector<64x8xf32>,
    %c0_28 = arith.constant 0 : index
    %c0_29 = arith.constant 0 : index
    %71 = vector.load %arg16[%c0_28, %c0_29] : memref<64x32xf32, #tpu.memory_space<vmem>>, vector<64x32xf32>
    %c0_30 = arith.constant 0 : index
    %c0_31 = arith.constant 0 : index
    %72 = vector.load %arg5[%c0_30, %c0_31] : memref<32x32xf32, #tpu.memory_space<vmem>>, vector<32x32xf32>
    %cst_32 = arith.constant dense<0.000000e+00> : vector<64x32xf32>
    %73 = tpu.matmul %71, %72, %cst_32 {dimension_numbers = #tpu.dot_dimension_numbers<[1], [0], [0], [1], [0, 0, 1, 1], [], []>} : vector<64x32xf32>, vector<32x32xf32>, vector<64x32xf32> -> vector<64x32xf32>
    %c0_33 = arith.constant 0 : index
    %c0_34 = arith.constant 0 : index
    %74 = vector.load %arg6[%c0_33, %c0_34] : memref<1x32xf32, #tpu.memory_space<vmem>>, vector<1x32xf32>
    %75 = vector.broadcast %74 : vector<1x32xf32> to vector<64x32xf32>
    %76 = arith.addf %73, %75 : vector<64x32xf32>
    %77 = arith.addf %0, %76 : vector<64x32xf32>
    %cst_35 = arith.constant dense<0.000000e+00> : vector<64xf32>
    %78 = vector.multi_reduction <add>, %77, %cst_35 [1] : vector<64x32xf32> to vector<64xf32>
    %79 = vector.shape_cast %78 : vector<64xf32> to vector<64x1xf32>
    %cst_36 = arith.constant 3.200000e+01 : f32
    %80 = vector.broadcast %cst_36 : f32 to vector<64x1xf32>
    %81 = arith.divf %79, %80 : vector<64x1xf32>
    %82 = vector.broadcast %81 : vector<64x1xf32> to vector<64x32xf32>
    %83 = arith.subf %77, %82 : vector<64x32xf32>
    %84 = arith.mulf %83, %83 : vector<64x32xf32>
    %cst_37 = arith.constant dense<0.000000e+00> : vector<64xf32>
    %85 = vector.multi_reduction <add>, %84, %cst_37 [1] : vector<64x32xf32> to vector<64xf32>
    %86 = vector.shape_cast %85 : vector<64xf32> to vector<64x1xf32>
    %cst_38 = arith.constant 3.200000e+01 : f32
    %87 = vector.broadcast %cst_38 : f32 to vector<64x1xf32>
    %88 = arith.divf %86, %87 : vector<64x1xf32>
    %89 = vector.broadcast %81 : vector<64x1xf32> to vector<64x32xf32>
    %90 = arith.subf %77, %89 : vector<64x32xf32>
    %cst_39 = arith.constant 9.99999974E-6 : f32
    %91 = vector.broadcast %cst_39 : f32 to vector<64x1xf32>
    %92 = arith.addf %88, %91 : vector<64x1xf32>
    %93 = math.rsqrt %92 : vector<64x1xf32>
    %94 = vector.broadcast %93 : vector<64x1xf32> to vector<64x32xf32>
    %95 = arith.mulf %90, %94 : vector<64x32xf32>
    %c0_40 = arith.constant 0 : index
    %c0_41 = arith.constant 0 : index
    %96 = vector.load %arg7[%c0_40, %c0_41] : memref<1x32xf32, #tpu.memory_space<vmem>>, vector<1x32xf32>
    %97 = vector.broadcast %96 : vector<1x32xf32> to vector<64x32xf32>
    %98 = arith.mulf %95, %97 : vector<64x32xf32>
    %c0_42 = arith.constant 0 : index
    %c0_43 = arith.constant 0 : index
    %99 = vector.load %arg8[%c0_42, %c0_43] : memref<1x32xf32, #tpu.memory_space<vmem>>, vector<1x32xf32>
    %100 = vector.broadcast %99 : vector<1x32xf32> to vector<64x32xf32>
    %101 = arith.addf %98, %100 : vector<64x32xf32>
    %c0_44 = arith.constant 0 : index
    %c0_45 = arith.constant 0 : index
    %102 = vector.load %arg9[%c0_44, %c0_45] : memref<32x128xf32, #tpu.memory_space<vmem>>, vector<32x128xf32>
    %cst_46 = arith.constant dense<0.000000e+00> : vector<64x128xf32>
    %103 = tpu.matmul %101, %102, %cst_46 {dimension_numbers = #tpu.dot_dimension_numbers<[1], [0], [0], [1], [0, 0, 1, 1], [], []>} : vector<64x32xf32>, vector<32x128xf32>, vector<64x128xf32> -> vector<64x128xf32>
    %c0_47 = arith.constant 0 : index
    %c0_48 = arith.constant 0 : index
    %104 = vector.load %arg10[%c0_47, %c0_48] : memref<1x128xf32, #tpu.memory_space<vmem>>, vector<1x128xf32>
    %105 = vector.broadcast %104 : vector<1x128xf32> to vector<64x128xf32>
    %106 = arith.addf %103, %105 : vector<64x128xf32>
    %cst_49 = arith.constant 0.000000e+00 : f32
    %107 = vector.broadcast %cst_49 : f32 to vector<64x128xf32>
    %108 = arith.maximumf %106, %107 : vector<64x128xf32>
    %c0_50 = arith.constant 0 : index
    %c0_51 = arith.constant 0 : index
    %109 = vector.load %arg11[%c0_50, %c0_51] : memref<128x32xf32, #tpu.memory_space<vmem>>, vector<128x32xf32>
    %cst_52 = arith.constant dense<0.000000e+00> : vector<64x32xf32>
    %110 = tpu.matmul %108, %109, %cst_52 {dimension_numbers = #tpu.dot_dimension_numbers<[1], [0], [0], [1], [0, 0, 1, 1], [], []>} : vector<64x128xf32>, vector<128x32xf32>, vector<64x32xf32> -> vector<64x32xf32>
    %c0_53 = arith.constant 0 : index
    %c0_54 = arith.constant 0 : index
    %111 = vector.load %arg12[%c0_53, %c0_54] : memref<1x32xf32, #tpu.memory_space<vmem>>, vector<1x32xf32>
    %112 = vector.broadcast %111 : vector<1x32xf32> to vector<64x32xf32>
    %113 = arith.addf %110, %112 : vector<64x32xf32>
    %114 = arith.addf %101, %113 : vector<64x32xf32>
    %cst_55 = arith.constant dense<0.000000e+00> : vector<64xf32>
    %115 = vector.multi_reduction <add>, %114, %cst_55 [1] : vector<64x32xf32> to vector<64xf32>
    %116 = vector.shape_cast %115 : vector<64xf32> to vector<64x1xf32>
    %cst_56 = arith.constant 3.200000e+01 : f32
    %117 = vector.broadcast %cst_56 : f32 to vector<64x1xf32>
    %118 = arith.divf %116, %117 : vector<64x1xf32>
    %119 = vector.broadcast %118 : vector<64x1xf32> to vector<64x32xf32>
    %120 = arith.subf %114, %119 : vector<64x32xf32>
    %121 = arith.mulf %120, %120 : vector<64x32xf32>
    %cst_57 = arith.constant dense<0.000000e+00> : vector<64xf32>
    %122 = vector.multi_reduction <add>, %121, %cst_57 [1] : vector<64x32xf32> to vector<64xf32>
    %123 = vector.shape_cast %122 : vector<64xf32> to vector<64x1xf32>
    %cst_58 = arith.constant 3.200000e+01 : f32
    %124 = vector.broadcast %cst_58 : f32 to vector<64x1xf32>
    %125 = arith.divf %123, %124 : vector<64x1xf32>
    %126 = vector.broadcast %118 : vector<64x1xf32> to vector<64x32xf32>
    %127 = arith.subf %114, %126 : vector<64x32xf32>
    %cst_59 = arith.constant 9.99999974E-6 : f32
    %128 = vector.broadcast %cst_59 : f32 to vector<64x1xf32>
    %129 = arith.addf %125, %128 : vector<64x1xf32>
    %130 = math.rsqrt %129 : vector<64x1xf32>
    %131 = vector.broadcast %130 : vector<64x1xf32> to vector<64x32xf32>
    %132 = arith.mulf %127, %131 : vector<64x32xf32>
    %c0_60 = arith.constant 0 : index
    %c0_61 = arith.constant 0 : index
    %133 = vector.load %arg13[%c0_60, %c0_61] : memref<1x32xf32, #tpu.memory_space<vmem>>, vector<1x32xf32>
    %134 = vector.broadcast %133 : vector<1x32xf32> to vector<64x32xf32>
    %135 = arith.mulf %132, %134 : vector<64x32xf32>
    %c0_62 = arith.constant 0 : index
    %c0_63 = arith.constant 0 : index
    %136 = vector.load %arg14[%c0_62, %c0_63] : memref<1x32xf32, #tpu.memory_space<vmem>>, vector<1x32xf32>
    %137 = vector.broadcast %136 : vector<1x32xf32> to vector<64x32xf32>
    %138 = arith.addf %135, %137 : vector<64x32xf32>
    %c0_64 = arith.constant 0 : index
    %c0_65 = arith.constant 0 : index
    %139 = vector.load %arg15[%c0_64, %c0_65] : memref<64x32xf32, #tpu.memory_space<vmem>>, vector<64x32xf32>
    tpu.vector_store %arg15[%c0_64, %c0_65], %138 {strides = array<i32>} : memref<64x32xf32, #tpu.memory_space<vmem>>, vector<64x32xf32>,
    return
  }
  func.func @transform_0(%arg0: i32) -> (i32, i32) {
    %c0_i32 = arith.constant 0 : i32
    %c0_i32_0 = arith.constant 0 : i32
    %c0_i32_1 = arith.constant 0 : i32
    return %c0_i32, %c0_i32_0 : i32, i32
  }
  func.func @transform_1(%arg0: i32) -> (i32, i32) {
    %c0_i32 = arith.constant 0 : i32
    %c0_i32_0 = arith.constant 0 : i32
    %c0_i32_1 = arith.constant 0 : i32
    return %c0_i32, %c0_i32_0 : i32, i32
  }
  func.func @transform_2(%arg0: i32) -> (i32, i32) {
    %c0_i32 = arith.constant 0 : i32
    %c0_i32_0 = arith.constant 0 : i32
    %c0_i32_1 = arith.constant 0 : i32
    return %c0_i32, %c0_i32_0 : i32, i32
  }
  func.func @transform_3(%arg0: i32) -> (i32, i32) {
    %c0_i32 = arith.constant 0 : i32
    %c0_i32_0 = arith.constant 0 : i32
    %c0_i32_1 = arith.constant 0 : i32
    return %c0_i32, %c0_i32_0 : i32, i32
  }
  func.func @transform_4(%arg0: i32) -> (i32, i32) {
    %c0_i32 = arith.constant 0 : i32
    %c0_i32_0 = arith.constant 0 : i32
    %c0_i32_1 = arith.constant 0 : i32
    return %c0_i32, %c0_i32_0 : i32, i32
  }
  func.func @transform_5(%arg0: i32) -> (i32, i32) {
    %c0_i32 = arith.constant 0 : i32
    %c0_i32_0 = arith.constant 0 : i32
    %c0_i32_1 = arith.constant 0 : i32
    return %c0_i32, %c0_i32_0 : i32, i32
  }
  func.func @transform_6(%arg0: i32) -> (i32, i32) {
    %c0_i32 = arith.constant 0 : i32
    %c0_i32_0 = arith.constant 0 : i32
    %c0_i32_1 = arith.constant 0 : i32
    return %c0_i32, %c0_i32_0 : i32, i32
  }
  func.func @transform_7(%arg0: i32) -> (i32, i32) {
    %c0_i32 = arith.constant 0 : i32
    %c0_i32_0 = arith.constant 0 : i32
    %c0_i32_1 = arith.constant 0 : i32
    return %c0_i32, %c0_i32_0 : i32, i32
  }
  func.func @transform_8(%arg0: i32) -> (i32, i32) {
    %c0_i32 = arith.constant 0 : i32
    %c0_i32_0 = arith.constant 0 : i32
    %c0_i32_1 = arith.constant 0 : i32
    return %c0_i32, %c0_i32_0 : i32, i32
  }
  func.func @transform_9(%arg0: i32) -> (i32, i32) {
    %c0_i32 = arith.constant 0 : i32
    %c0_i32_0 = arith.constant 0 : i32
    %c0_i32_1 = arith.constant 0 : i32
    return %c0_i32, %c0_i32_0 : i32, i32
  }
  func.func @transform_10(%arg0: i32) -> (i32, i32) {
    %c0_i32 = arith.constant 0 : i32
    %c0_i32_0 = arith.constant 0 : i32
    %c0_i32_1 = arith.constant 0 : i32
    return %c0_i32, %c0_i32_0 : i32, i32
  }
  func.func @transform_11(%arg0: i32) -> (i32, i32) {
    %c0_i32 = arith.constant 0 : i32
    %c0_i32_0 = arith.constant 0 : i32
    %c0_i32_1 = arith.constant 0 : i32
    return %c0_i32, %c0_i32_0 : i32, i32
  }
  func.func @transform_12(%arg0: i32) -> (i32, i32) {
    %c0_i32 = arith.constant 0 : i32
    %c0_i32_0 = arith.constant 0 : i32
    %c0_i32_1 = arith.constant 0 : i32
    return %c0_i32, %c0_i32_0 : i32, i32
  }
  func.func @transform_13(%arg0: i32) -> (i32, i32) {
    %c0_i32 = arith.constant 0 : i32
    %c0_i32_0 = arith.constant 0 : i32
    %c0_i32_1 = arith.constant 0 : i32
    return %c0_i32, %c0_i32_0 : i32, i32
  }
  func.func @transform_14(%arg0: i32) -> (i32, i32) {
    %c0_i32 = arith.constant 0 : i32
    %c0_i32_0 = arith.constant 0 : i32
    %c0_i32_1 = arith.constant 0 : i32
    return %c0_i32, %c0_i32_0 : i32, i32
  }
}

</mosaic_0001>

<bundles_post_ra>
// kernel: tpu_custom_call.1
= control target key start
LH: loop header
LB: loop body
LE: loop exit
PB: predicated region body
PF: predicated region fallthrough
CT: control target
= control target key end

     0   :  { %vm66_vm0 = vcmask 261120   ;;  %vm228_vm1 = vcmask 64512   ;;  %s3900_s22 = smov 96   ;;  %vm366_vm3 = vcmask 523264   ;;  %s3902_s20 = smov 88   ;;  %vm1058_vm4 = vcmask 130112   ;;  %s5055_s1 = inlined_call_operand.vmem [shape: f32[32,128], index: 1, kind: input, shape index: {}]   ;;  %s5056_s0 = inlined_call_operand.vmem [shape: f32[64,32], index: 0, kind: input, shape index: {}]   ;;  %s5057_s2 = inlined_call_operand.vmem [shape: f32[1,128], index: 2, kind: input, shape index: {}]   ;;  %s5058_s3 = inlined_call_operand.vmem [shape: f32[64,64], index: 3, kind: input, shape index: {}]   ;;  %s5059_s4 = inlined_call_operand.vmem [shape: f32[32,32], index: 4, kind: input, shape index: {}]   ;;  %s5060_s5 = inlined_call_operand.vmem [shape: f32[1,32], index: 5, kind: input, shape index: {}]   ;;  %s5061_s8 = inlined_call_operand.vmem [shape: f32[32,128], index: 8, kind: input, shape index: {}]   ;;  %s5062_s10 = inlined_call_operand.vmem [shape: f32[128,32], index: 10, kind: input, shape index: {}]   ;;  %s5063_s6 = inlined_call_operand.vmem [shape: f32[1,32], index: 6, kind: input, shape index: {}]   ;;  %s5064_s7 = inlined_call_operand.vmem [shape: f32[1,32], index: 7, kind: input, shape index: {}]   ;;  %s5065_s9 = inlined_call_operand.vmem [shape: f32[1,128], index: 9, kind: input, shape index: {}]   ;;  %s5066_s11 = inlined_call_operand.vmem [shape: f32[1,32], index: 11, kind: input, shape index: {}]   ;;  %s5067_s12 = inlined_call_operand.vmem [shape: f32[1,32], index: 12, kind: input, shape index: {}]   ;;  %s5068_s13 = inlined_call_operand.vmem [shape: f32[1,32], index: 13, kind: input, shape index: {}]   ;;  %s5069_s14 = inlined_call_operand.vmem [shape: f32[64,32], index: 14, kind: output, shape index: {}]  }
   0x1   :  { %v55_v0 = vld [vmem:[%s5055_s1] sm:$0xff]  ;;  %v56_v1 = vld [vmem:[%s5055_s1 + $0x8] sm:$0xff]  ;;  %v57_v2 = vld [vmem:[%s5055_s1 + $0x10] sm:$0xff]  ;;  %s3903_s23 = smov 80   ;;  %s3905_s24 = smov 112   ;;  %vm1509_vm5 = vcmask 195712  }
   0x2   :  { %v3334_v3 = vpack.c.bf16 %v56_v1, %v55_v0  ;;  %v58_v4 = vld [vmem:[%s5055_s1 + $0x18] sm:$0xff]  ;;  %v47_v5 = vld [vmem:[%s5056_s0] sm:$0xff]  ;;  %v48_v7 = vld [vmem:[%s5056_s0 + $0x8] sm:$0xff]  ;;  %s3906_s25 = smov 56   ;;  %s3907_s26 = smov 48   ;;  %vm1960_vm6 = vcmask 261312  }
   0x3   :  { %v3338_v6 = vpack.c.bf16 %v58_v4, %v57_v2  ;;  %3014 = vmatprep.mubr.msk.f32.mxu0 %vm66_vm0, %v47_v5  ;;  %v49_v8 = vld [vmem:[%s5056_s0 + $0x10] sm:$0xff]  ;;  %v50_v9 = vld [vmem:[%s5056_s0 + $0x18] sm:$0xff]  ;;  %v51_v10 = vld [vmem:[%s5056_s0 + $0x20] sm:$0xff]  ;;  %s3908_s1 = smov 72   ;;  %s3909_s27 = smov 104  }
   0x4   :  { %3335 = vmatprep.subr.bf16.mxu0 %v3334_v3  ;;  %v52_v11 = vld [vmem:[%s5056_s0 + $0x28] sm:$0xff]  ;;  %v53_v12 = vld [vmem:[%s5056_s0 + $0x30] sm:$0xff]  ;;  %v54_v13 = vld [vmem:[%s5056_s0 + $0x38] sm:$0xff] }
   0x5   :  { %3337 = vmatpush3.bf16.msra.mxu0 %v3334_v3  ;;  %v2690_v14 = vld [vmem:[%s5057_s2] ss:$0 sm:$0xff]  ;;  %s3901_s2 = smov 64   ;;  %vm4078_vm2 = vmpackc.low %vm228_vm1, %vm228_vm1  ;;  %v4115_v56 = vld [vmem:[%s5058_s3 + $0x8] sm:$0xff] }
   0x6   :  { %3339 = vmatprep.subr.bf16.mxu0 %v3338_v6  ;;  %v4120_v57 = vld [vmem:[%s5058_s3] sm:$0xff]  ;;  %v4127_v62 = vld [vmem:[%s5058_s3 + $0x18] sm:$0xff]  ;;  %v4137_v4 = vld [vmem:[%s5058_s3 + $0x10] sm:$0xff] }
   0x7   :  { %v4142_v5 = vld [vmem:[%s5058_s3 + $0x20] sm:$0xff] }
   0x9   :  { %3341 = vmatpush3.bf16.msra.mxu0 %v3338_v6 }
   0xc   :  { %3015 = vmatmul.mubr.msk.f32.vlgmr.msra.gmra.mrb[0].mxu0 %vm66_vm0, %v48_v7 }
   0xd   :  { %3017 = vmatprep.mubr.msk.f32.mxu0 %vm66_vm0, %v49_v8 }
  0x10   :  { %3018 = vmatmul.mubr.msk.f32.gmra.mrb[2].mxu0 %vm66_vm0, %v50_v9  ;;  %v4152_v9 = vld [vmem:[%s5058_s3 + $0x28] sm:$0xff] }
  0x11   :  { %3020 = vmatprep.mubr.msk.f32.mxu0 %vm66_vm0, %v51_v10 }
  0x14   :  { %3021 = vmatmul.mubr.msk.f32.gmra.mrb[4].mxu0 %vm66_vm0, %v52_v11 }
  0x15   :  { %3023 = vmatprep.mubr.msk.f32.mxu0 %vm66_vm0, %v53_v12 }
  0x18   :  { %3024 = vmatmul.mubr.msk.f32.gmra.mrb[6].mxu0 %vm66_vm0, %v54_v13 }
  0xdf   :  { %v3016_v15 = vpop.f32.mrb[0].mxu0 }
  0xe0   :  { %v4036_v16 = vadd.f32 %v3016_v15, %v2690_v14  ;;  %v157_v17 = vpop.f32.mrb[1].mxu0 }
  0xe1   :  { %v4038_v18 = vadd.f32 %v2690_v14, %v157_v17  ;;  %v4167_v17 = vld [vmem:[%s5058_s3 + $0x38] sm:$0xff] }
  0xe3   :  { %3042 = vmatprep.mubr.msk.f32.mxu1 %vm228_vm1, %v4038_v18  ;;  %v3019_v19 = vpop.f32.mrb[2].mxu0  ;;  %v4044_v20 = vpack.i.bf16 %v4036_v16, %v4038_v18 }
  0xe4   :  { %v4046_v21 = vadd.f32 %v3019_v19, %v2690_v14  ;;  %v167_v22 = vpop.f32.mrb[3].mxu0 }
  0xe5   :  { %3565 = vrot.lane.b32.xlu0 %v4044_v20, %s3900_s22  ;;  %v4049_v23 = vadd.f32 %v2690_v14, %v167_v22 }
  0xe7   :  { %v3022_v24 = vpop.f32.mrb[4].mxu0  ;;  %v4053_v25 = vpack.i.bf16 %v4046_v21, %v4049_v23 }
  0xe8   :  { %v4055_v26 = vadd.f32 %v3022_v24, %v2690_v14  ;;  %v177_v27 = vpop.f32.mrb[5].mxu0 }
  0xe9   :  { %v4057_v28 = vadd.f32 %v2690_v14, %v177_v27  ;;  %3570 = vrot.lane.b32.xlu0 %v4053_v25, %s3900_s22 }
  0xeb   :  { %v3025_v29 = vpop.f32.mrb[6].mxu0  ;;  %v4062_v30 = vpack.i.bf16 %v4055_v26, %v4057_v28 }
  0xec   :  { %v4064_v31 = vadd.f32 %v3025_v29, %v2690_v14  ;;  %v187_v32 = vpop.f32.mrb[7].mxu0  ;;  %v4187_v29 = vld [vmem:[%s5058_s3 + $0x30] sm:$0xff] }
  0xed   :  { %v4066_v33 = vadd.f32 %v2690_v14, %v187_v32  ;;  %3575 = vrot.lane.b32.xlu1 %v4062_v30, %s3900_s22 }
  0xef   :  { %v4071_v34 = vpack.i.bf16 %v4064_v31, %v4066_v33 }
  0xf1   :  { %3580 = vrot.lane.b32.xlu1 %v4071_v34, %s3900_s22 }
  0xf5   :  { %3585 = vrot.lane.b32.xlu1 %v4044_v20, %s3901_s2 }
 0x157   :  { %v3566_v35 = vpop.permute.xlu0 %3565 }
 0x158   :  { %v3568_v36 = vunpack.i.h.bf16 %v3566_v35  ;;  %v3567_v37 = vunpack.i.l.bf16 %v3566_v35 }
 0x15a   :  { %v3342_v39 = vpack.c.bf16 %v3568_v36, %v3567_v37 }
 0x15b   :  { %v3571_v40 = vpop.permute.xlu0 %3570 }
 0x15c   :  { %3344 = vmatprep.subr.msk.bf16.mxu1 %vm4078_vm2, %v3342_v39  ;;  %v3573_v41 = vunpack.i.h.bf16 %v3571_v40  ;;  %v3572_v42 = vunpack.i.l.bf16 %v3571_v40 }
 0x15d   :  { %3347 = vmatpush3.bf16.xpose.msk.msra.mxu1 %vm4078_vm2, %v3342_v39 }
 0x15e   :  { %v3348_v43 = vpack.c.bf16 %v3573_v41, %v3572_v42 }
 0x15f   :  { %v3576_v44 = vpop.permute.xlu1 %3575 }
 0x160   :  { %v3578_v45 = vunpack.i.h.bf16 %v3576_v44  ;;  %v3577_v46 = vunpack.i.l.bf16 %v3576_v44  ;;  %3350 = vmatprep.subr.msk.bf16.mxu1 %vm4078_vm2, %v3348_v43 }
 0x162   :  { %v3354_v47 = vpack.c.bf16 %v3578_v45, %v3577_v46 }
 0x163   :  { %v3581_v48 = vpop.permute.xlu1 %3580 }
 0x164   :  { %v3583_v49 = vunpack.i.h.bf16 %v3581_v48  ;;  %v3582_v50 = vunpack.i.l.bf16 %v3581_v48 }
 0x165   :  { %3353 = vmatpush3.bf16.xpose.msk.msra.mxu1 %vm4078_vm2, %v3348_v43 }
 0x166   :  { %3356 = vmatprep.subr.msk.bf16.mxu1 %vm4078_vm2, %v3354_v47  ;;  %v3360_v54 = vpack.c.bf16 %v3583_v49, %v3582_v50 }
 0x167   :  { %v3586_v51 = vpop.permute.xlu1 %3585 }
 0x168   :  { %v3588_v52 = vunpack.i.h.bf16 %v3586_v51  ;;  %v3587_v53 = vunpack.i.l.bf16 %v3586_v51 }
 0x16a   :  { %v3366_v55 = vpack.c.bf16 %v3588_v52, %v3587_v53 }
 0x16c   :  { %3367 = vmatprep.subr.bf16.mxu0 %v3366_v55 }
 0x16d   :  { %3359 = vmatpush3.bf16.xpose.msk.msra.mxu1 %vm4078_vm2, %v3354_v47  ;;  %3369 = vmatpush3.bf16.msra.mxu0 %v3366_v55 }
 0x16e   :  { %3362 = vmatprep.subr.msk.bf16.mxu1 %vm4078_vm2, %v3360_v54 }
 0x175   :  { %3365 = vmatpush3.bf16.xpose.msk.msra.mxu1 %vm4078_vm2, %v3360_v54 }
 0x17c   :  { %3043 = vmatmul.mubr.msk.f32.vlgmr.msra.gmra.mrb[0].mxu1 %vm228_vm1, %v4036_v16 }
 0x17d   :  { %3045 = vmatprep.mubr.msk.f32.mxu1 %vm228_vm1, %v4049_v23 }
 0x180   :  { %3046 = vmatmul.mubr.msk.f32.gmra.mrb[2].mxu1 %vm228_vm1, %v4046_v21 }
 0x181   :  { %3048 = vmatprep.mubr.msk.f32.mxu1 %vm228_vm1, %v4057_v28 }
 0x184   :  { %3049 = vmatmul.mubr.msk.f32.gmra.mrb[4].mxu1 %vm228_vm1, %v4055_v26 }
 0x185   :  { %3051 = vmatprep.mubr.msk.f32.mxu1 %vm228_vm1, %v4066_v33 }
 0x188   :  { %3052 = vmatmul.mubr.msk.f32.gmra.mrb[6].mxu1 %vm228_vm1, %v4064_v31 }
 0x24f   :  { %v3044_v58 = vpop.f32.mrb[0].mxu1 }
 0x250   :  { %v333_v59 = vadd.f32 %v3044_v58, %v4115_v56  ;;  %v327_v60 = vpop.f32.mrb[1].mxu1 }
 0x251   :  { %v328_v61 = vadd.f32 %v327_v60, %v4120_v57 }
 0x252   :  { %v370_v63 = vsel %vm366_vm3, %v333_v59, -inf }
 0x253   :  { %371 = vmax.xlane.f32.xlu1 %v370_v63  ;;  %v3047_v0 = vpop.f32.mrb[2].mxu1  ;;  %v367_v1 = vsel %vm366_vm3, %v328_v61, -inf }
 0x254   :  { %v4132_v2 = vadd.f32 %v3047_v0, %v4127_v62  ;;  %v337_v3 = vpop.f32.mrb[3].mxu1  ;;  %368 = vmax.xlane.f32.xlu0 %v367_v1 }
 0x255   :  { %v4147_v7 = vadd.f32 %v337_v3, %v4137_v4 }
 0x256   :  { %v376_v6 = vsel %vm366_vm3, %v4132_v2, -inf }
 0x257   :  { %v3050_v8 = vpop.f32.mrb[4].mxu1  ;;  %v373_v15 = vsel %vm366_vm3, %v4147_v7, -inf }
 0x258   :  { %v347_v10 = vpop.f32.mrb[5].mxu1  ;;  %377 = vmax.xlane.f32.xlu0 %v376_v6  ;;  %v4158_v12 = vadd.f32 %v3050_v8, %v4152_v9 }
 0x259   :  { %v4155_v11 = vadd.f32 %v347_v10, %v4142_v5 }
 0x25a   :  { %v382_v24 = vsel %vm366_vm3, %v4158_v12, -inf }
 0x25b   :  { %v3053_v13 = vpop.f32.mrb[6].mxu1  ;;  %v379_v14 = vsel %vm366_vm3, %v4155_v11, -inf }
 0x25c   :  { %v357_v19 = vpop.f32.mrb[7].mxu1  ;;  %380 = vmax.xlane.f32.xlu1 %v379_v14  ;;  %374 = vmax.xlane.f32.xlu0 %v373_v15  ;;  %v4170_v22 = vadd.f32 %v3053_v13, %v4167_v17 }
 0x25d   :  { %v4190_v32 = vadd.f32 %v357_v19, %v4187_v29 }
 0x25e   :  { %v388_v27 = vsel %vm366_vm3, %v4170_v22, -inf }
 0x25f   :  { %v385_v35 = vsel %vm366_vm3, %v4190_v32, -inf }
 0x260   :  { %383 = vmax.xlane.f32.xlu0 %v382_v24 }
 0x264   :  { %389 = vmax.xlane.f32.xlu0 %v388_v27 }
 0x26d   :  { %3595 = vrot.lane.b32.xlu1 %v4062_v30, %s3901_s2 }
 0x271   :  { %3600 = vrot.lane.b32.xlu1 %v4071_v34, %s3901_s2 }
 0x275   :  { %3605 = vrot.lane.b32.xlu1 %v4044_v20, %s3902_s20 }
 0x27a   :  { %3590 = vrot.lane.b32.xlu0 %v4053_v25, %s3901_s2  ;;  %s3904_s2 = smov 120  }
 0x299   :  { %386 = vmax.xlane.f32.xlu1 %v385_v35 }
 0x2aa   :  { %3615 = vrot.lane.b32.xlu1 %v4062_v30, %s3902_s20 }
 0x2ae   :  { %3620 = vrot.lane.b32.xlu1 %v4044_v20, %s3903_s23 }
 0x2e0   :  { %v372_v36 = vpop.xlane.xlu1 %371 }
 0x2e1   :  { %v392_v37 = vsub.f32 %v333_v59, %v372_v36  ;;  %v369_v39 = vpop.xlane.xlu0 %368 }
 0x2e2   :  { %v391_v40 = vsub.f32 %v328_v61, %v369_v39 }
 0x2e3   :  { %v401_v41 = vmul.f32 1.442695, %v392_v37 }
 0x2e4   :  { %v399_v42 = vmul.f32 1.442695, %v391_v40 }
 0x2e5   :  { %3724 = vpow2.f32 %v401_v41  ;;  %v378_v43 = vpop.xlane.xlu0 %377 }
 0x2e6   :  { %3726 = vpow2.f32 %v399_v42  ;;  %v394_v15 = vsub.f32 %v4132_v2, %v378_v43 }
 0x2e8   :  { %v405_v27 = vmul.f32 1.442695, %v394_v15 }
 0x2e9   :  { %v375_v44 = vpop.xlane.xlu0 %374  ;;  %v381_v45 = vpop.xlane.xlu1 %380 }
 0x2ea   :  { %v393_v14 = vsub.f32 %v4147_v7, %v375_v44  ;;  %v395_v35 = vsub.f32 %v4155_v11, %v381_v45 }
 0x2ec   :  { %v403_v19 = vmul.f32 1.442695, %v393_v14  ;;  %v407_v37 = vmul.f32 1.442695, %v395_v35 }
 0x2ed   :  { %v384_v46 = vpop.xlane.xlu0 %383  ;;  %v3596_v49 = vpop.permute.xlu1 %3595 }
 0x2ee   :  { %v3598_v58 = vunpack.i.h.bf16 %v3596_v49  ;;  %v3597_v59 = vunpack.i.l.bf16 %v3596_v49  ;;  %v396_v24 = vsub.f32 %v4158_v12, %v384_v46  ;;  %3728 = vpow2.f32 %v403_v19 }
 0x2ef   :  { %v4198_v47 = vpop.eup %3724  ;;  %3730 = vpow2.f32 %v405_v27 }
 0x2f0   :  { %v4200_v48 = vpop.eup %3726  ;;  %v418_v50 = vsel %vm366_vm3, %v4198_v47, 0.0  ;;  %v3374_v1 = vpack.c.bf16 %v3598_v58, %v3597_v59  ;;  %v409_v36 = vmul.f32 1.442695, %v396_v24 }
 0x2f1   :  { %419 = vadd.xlane.f32.xlu0 %v418_v50  ;;  %v390_v51 = vpop.xlane.xlu0 %389  ;;  %v415_v52 = vsel %vm366_vm3, %v4200_v48, 0.0  ;;  %v3601_v54 = vpop.permute.xlu1 %3600 }
 0x2f2   :  { %416 = vadd.xlane.f32.xlu1 %v415_v52  ;;  %v3603_v63 = vunpack.i.h.bf16 %v3601_v54  ;;  %v3602_v0 = vunpack.i.l.bf16 %v3601_v54  ;;  %3732 = vpow2.f32 %v409_v36  ;;  %v398_v39 = vsub.f32 %v4170_v22, %v390_v51 }
 0x2f3   :  { %3734 = vpow2.f32 %v407_v37 }
 0x2f4   :  { %v3378_v10 = vpack.c.bf16 %v3603_v63, %v3602_v0  ;;  %v413_v40 = vmul.f32 1.442695, %v398_v39 }
 0x2f5   :  { %v3591_v53 = vpop.permute.xlu0 %3590  ;;  %v3606_v3 = vpop.permute.xlu1 %3605 }
 0x2f6   :  { %v3593_v55 = vunpack.i.h.bf16 %v3591_v53  ;;  %v3592_v60 = vunpack.i.l.bf16 %v3591_v53  ;;  %v3608_v6 = vunpack.i.h.bf16 %v3606_v3  ;;  %v3607_v8 = vunpack.i.l.bf16 %v3606_v3 }
 0x2f7   :  { %3736 = vpow2.f32 %v413_v40 }
 0x2f8   :  { %v3370_v61 = vpack.c.bf16 %v3593_v55, %v3592_v60  ;;  %v4206_v13 = vpack.c.bf16 %v3608_v6, %v3607_v8  ;;  %v4220_v41 = vpop.eup %3728 }
 0x2f9   :  { %v4222_v7 = vpop.eup %3730  ;;  %v421_v2 = vsel %vm366_vm3, %v4220_v41, 0.0 }
 0x2fa   :  { %3371 = vmatprep.subr.bf16.mxu0 %v3370_v61  ;;  %v424_v42 = vsel %vm366_vm3, %v4222_v7, 0.0 }
 0x2fb   :  { %3373 = vmatpush3.bf16.msra.mxu0 %v3370_v61 }
 0x2fc   :  { %3375 = vmatprep.subr.bf16.mxu0 %v3374_v1  ;;  %v4226_v12 = vpop.eup %3732 }
 0x2fd   :  { %v430_v44 = vsel %vm366_vm3, %v4226_v12, 0.0  ;;  %v4233_v45 = vpop.eup %3734 }
 0x2fe   :  { %v427_v49 = vsel %vm366_vm3, %v4233_v45, 0.0 }
 0x2ff   :  { %3377 = vmatpush3.bf16.msra.mxu0 %v3374_v1 }
 0x300   :  { %3379 = vmatprep.subr.bf16.mxu0 %v3378_v10 }
 0x301   :  { %v4237_v50 = vpop.eup %3736 }
 0x302   :  { %v436_v54 = vsel %vm366_vm3, %v4237_v50, 0.0 }
 0x303   :  { %3625 = vrot.lane.b32.xlu1 %v4071_v34, %s3902_s20  ;;  %3381 = vmatpush3.bf16.msra.mxu0 %v3378_v10 }
 0x304   :  { %3384 = vmatprep.subr.msk.bf16.mxu0 %vm4078_vm2, %v4206_v13 }
 0x307   :  { %3610 = vrot.lane.b32.xlu0 %v4053_v25, %s3902_s20  ;;  %s3913_s20 = smov 24  }
 0x326   :  { %v387_v11 = vpop.xlane.xlu1 %386  ;;  %422 = vadd.xlane.f32.xlu0 %v421_v2 }
 0x327   :  { %v397_v43 = vsub.f32 %v4190_v32, %v387_v11  ;;  %425 = vadd.xlane.f32.xlu1 %v424_v42 }
 0x329   :  { %v411_v22 = vmul.f32 1.442695, %v397_v43 }
 0x32a   :  { %v3616_v46 = vpop.permute.xlu1 %3615  ;;  %431 = vadd.xlane.f32.xlu0 %v430_v44 }
 0x32b   :  { %3738 = vpow2.f32 %v411_v22  ;;  %v3618_v14 = vunpack.i.h.bf16 %v3616_v46  ;;  %v3617_v15 = vunpack.i.l.bf16 %v3616_v46 }
 0x32d   :  { %v3394_v19 = vpack.c.bf16 %v3618_v14, %v3617_v15 }
 0x32e   :  { %v3621_v51 = vpop.permute.xlu1 %3620  ;;  %428 = vadd.xlane.f32.xlu0 %v427_v49 }
 0x32f   :  { %v3623_v52 = vunpack.i.h.bf16 %v3621_v51  ;;  %v3622_v53 = vunpack.i.l.bf16 %v3621_v51 }
 0x331   :  { %v3422_v32 = vpack.c.bf16 %v3623_v52, %v3622_v53 }
 0x332   :  { %437 = vadd.xlane.f32.xlu0 %v436_v54 }
 0x333   :  { %3424 = vmatprep.subr.msk.bf16.mxu1 %vm4078_vm2, %v3422_v32 }
 0x334   :  { %3427 = vmatpush3.bf16.xpose.msk.msra.mxu1 %vm4078_vm2, %v3422_v32 }
 0x335   :  { %v4245_v55 = vpop.eup %3738 }
 0x336   :  { %v433_v58 = vsel %vm366_vm3, %v4245_v55, 0.0 }
 0x337   :  { %434 = vadd.xlane.f32.xlu0 %v433_v58 }
 0x338   :  { %3630 = vrot.lane.b32.xlu1 %v4053_v25, %s3903_s23 }
 0x33c   :  { %618 = vrot.lane.b32.xlu1 %v4036_v16, %s3904_s2 }
 0x340   :  { %620 = vrot.lane.b32.xlu1 %v4049_v23, %s3904_s2 }
 0x344   :  { %3640 = vrot.lane.b32.xlu1 %v4071_v34, %s3903_s23 }
 0x348   :  { %626 = vrot.lane.b32.xlu1 %v4055_v26, %s3904_s2 }
 0x34c   :  { %630 = vrot.lane.b32.xlu1 %v4064_v31, %s3904_s2 }
 0x34d   :  { %616 = vrot.lane.b32.xlu0 %v4038_v18, %s3904_s2 }
 0x350   :  { %1069 = vrot.lane.b32.xlu1 %v4036_v16, %s3905_s24 }
 0x351   :  { %3635 = vrot.lane.b32.xlu0 %v4062_v30, %s3903_s23 }
 0x354   :  { %1073 = vrot.lane.b32.xlu1 %v4046_v21, %s3905_s24 }
 0x355   :  { %622 = vrot.lane.b32.xlu0 %v4046_v21, %s3904_s2 }
 0x358   :  { %1077 = vrot.lane.b32.xlu1 %v4055_v26, %s3905_s24 }
 0x359   :  { %624 = vrot.lane.b32.xlu0 %v4057_v28, %s3904_s2 }
 0x35c   :  { %1081 = vrot.lane.b32.xlu1 %v4064_v31, %s3905_s24 }
 0x35d   :  { %628 = vrot.lane.b32.xlu0 %v4066_v33, %s3904_s2 }
 0x361   :  { %1067 = vrot.lane.b32.xlu0 %v4038_v18, %s3905_s24 }
 0x365   :  { %1071 = vrot.lane.b32.xlu0 %v4049_v23, %s3905_s24 }
 0x369   :  { %1075 = vrot.lane.b32.xlu0 %v4057_v28, %s3905_s24 }
 0x36d   :  { %1079 = vrot.lane.b32.xlu0 %v4066_v33, %s3905_s24 }
 0x37e   :  { %v420_v59 = vpop.xlane.xlu0 %419 }
 0x37f   :  { %3740 = vrcp.f32 %v420_v59  ;;  %v417_v60 = vpop.xlane.xlu1 %416 }
 0x380   :  { %3742 = vrcp.f32 %v417_v60 }
 0x382   :  { %v3611_v61 = vpop.permute.xlu0 %3610 }
 0x383   :  { %v3613_v1 = vunpack.i.h.bf16 %v3611_v61  ;;  %v3612_v3 = vunpack.i.l.bf16 %v3611_v61  ;;  %v3626_v24 = vpop.permute.xlu1 %3625 }
 0x385   :  { %v3388_v10 = vpack.c.bf16 %v3613_v1, %v3612_v3 }
 0x389   :  { %v3741_v63 = vpop.eup %3740 }
 0x38a   :  { %v3743_v0 = vpop.eup %3742  ;;  %v442_v8 = vmul.f32 %v3741_v63, %v4198_v47  ;;  %v3628_v47 = vunpack.i.h.bf16 %v3626_v24 }
 0x38b   :  { %v440_v6 = vmul.f32 %v3743_v0, %v4200_v48  ;;  %v3627_v48 = vunpack.i.l.bf16 %v3626_v24 }
 0x38d   :  { %3070 = vmatprep.mubr.msk.f32.mxu0 %vm366_vm3, %v440_v6  ;;  %v3400_v27 = vpack.c.bf16 %v3628_v47, %v3627_v48 }
 0x38e   :  { %3071 = vmatmul.mubr.msk.f32.vlgmr.msra.gmra.mrb[8].mxu0 %vm366_vm3, %v442_v8 }
 0x38f   :  { %3387 = vmatpush3.bf16.xpose.msk.msra.mxu0 %vm4078_vm2, %v4206_v13 }
 0x390   :  { %3390 = vmatprep.subr.msk.bf16.mxu0 %vm4078_vm2, %v3388_v10 }
 0x397   :  { %3393 = vmatpush3.bf16.xpose.msk.msra.mxu0 %vm4078_vm2, %v3388_v10 }
 0x398   :  { %3396 = vmatprep.subr.msk.bf16.mxu0 %vm4078_vm2, %v3394_v19 }
 0x39f   :  { %3399 = vmatpush3.bf16.xpose.msk.msra.mxu0 %vm4078_vm2, %v3394_v19 }
 0x3a0   :  { %3402 = vmatprep.subr.msk.bf16.mxu0 %vm4078_vm2, %v3400_v27 }
 0x3a7   :  { %3405 = vmatpush3.bf16.xpose.msk.msra.mxu0 %vm4078_vm2, %v3400_v27 }
 0x3b3   :  { %v423_v13 = vpop.xlane.xlu0 %422 }
 0x3b4   :  { %3744 = vrcp.f32 %v423_v13  ;;  %v426_v35 = vpop.xlane.xlu1 %425 }
 0x3b5   :  { %3746 = vrcp.f32 %v426_v35 }
 0x3b7   :  { %v432_v36 = vpop.xlane.xlu0 %431 }
 0x3b8   :  { %v3631_v37 = vpop.permute.xlu1 %3630  ;;  %3748 = vrcp.f32 %v432_v36 }
 0x3b9   :  { %v3633_v39 = vunpack.i.h.bf16 %v3631_v37  ;;  %v3632_v40 = vunpack.i.l.bf16 %v3631_v37 }
 0x3bb   :  { %v3428_v2 = vpack.c.bf16 %v3633_v39, %v3632_v40  ;;  %v429_v11 = vpop.xlane.xlu0 %428 }
 0x3bc   :  { %3750 = vrcp.f32 %v429_v11  ;;  %v619_v42 = vpop.permute.xlu1 %618 }
 0x3bd   :  { %3430 = vmatprep.subr.msk.bf16.mxu1 %vm4078_vm2, %v3428_v2 }
 0x3be   :  { %v3745_v43 = vpop.eup %3744  ;;  %3433 = vmatpush3.bf16.xpose.msk.msra.mxu1 %vm4078_vm2, %v3428_v2 }
 0x3bf   :  { %v3747_v22 = vpop.eup %3746  ;;  %v438_v44 = vpop.xlane.xlu0 %437  ;;  %v444_v46 = vmul.f32 %v3745_v43, %v4220_v41 }
 0x3c0   :  { %v446_v49 = vmul.f32 %v3747_v22, %v4222_v7  ;;  %v621_v51 = vpop.permute.xlu1 %620  ;;  %3752 = vrcp.f32 %v438_v44 }
 0x3c1   :  { %3073 = vmatprep.mubr.msk.f32.mxu0 %vm366_vm3, %v444_v46 }
 0x3c2   :  { %3074 = vmatmul.mubr.msk.f32.gmra.mrb[10].mxu0 %vm366_vm3, %v446_v49  ;;  %v3749_v53 = vpop.eup %3748 }
 0x3c3   :  { %v450_v60 = vmul.f32 %v3749_v53, %v4226_v12 }
 0x3c4   :  { %v435_v52 = vpop.xlane.xlu0 %434  ;;  %v3641_v58 = vpop.permute.xlu1 %3640 }
 0x3c5   :  { %3754 = vrcp.f32 %v435_v52  ;;  %v3643_v7 = vunpack.i.h.bf16 %v3641_v58  ;;  %v3642_v61 = vunpack.i.l.bf16 %v3641_v58 }
 0x3c6   :  { %v3751_v32 = vpop.eup %3750 }
 0x3c7   :  { %v448_v54 = vmul.f32 %v3751_v32, %v4233_v45  ;;  %v3440_v14 = vpack.c.bf16 %v3643_v7, %v3642_v61 }
 0x3c8   :  { %v617_v59 = vpop.permute.xlu0 %616  ;;  %v627_v3 = vpop.permute.xlu1 %626 }
 0x3c9   :  { %3076 = vmatprep.mubr.msk.f32.mxu0 %vm366_vm3, %v448_v54 }
 0x3ca   :  { %3077 = vmatmul.mubr.msk.f32.gmra.mrb[12].mxu0 %vm366_vm3, %v450_v60  ;;  %v3753_v1 = vpop.eup %3752 }
 0x3cb   :  { %v454_v12 = vmul.f32 %v3753_v1, %v4237_v50 }
 0x3cc   :  { %v3636_v41 = vpop.permute.xlu0 %3635  ;;  %v631_v15 = vpop.permute.xlu1 %630 }
 0x3cd   :  { %v3638_v63 = vunpack.i.h.bf16 %v3636_v41  ;;  %v3637_v0 = vunpack.i.l.bf16 %v3636_v41 }
 0x3cf   :  { %v3755_v6 = vpop.eup %3754  ;;  %v3434_v8 = vpack.c.bf16 %v3638_v63, %v3637_v0 }
 0x3d0   :  { %v623_v10 = vpop.permute.xlu0 %622  ;;  %v452_v45 = vmul.f32 %v3755_v6, %v4245_v55  ;;  %v1070_v50 = vpop.permute.xlu1 %1069 }
 0x3d1   :  { %3436 = vmatprep.subr.msk.bf16.mxu1 %vm4078_vm2, %v3434_v8 }
 0x3d2   :  { %3079 = vmatprep.mubr.msk.f32.mxu0 %vm366_vm3, %v452_v45  ;;  %3439 = vmatpush3.bf16.xpose.msk.msra.mxu1 %vm4078_vm2, %v3434_v8 }
 0x3d3   :  { %3080 = vmatmul.mubr.msk.f32.gmra.mrb[14].mxu0 %vm366_vm3, %v454_v12  ;;  %3442 = vmatprep.subr.msk.bf16.mxu1 %vm4078_vm2, %v3440_v14 }
 0x3d4   :  { %v625_v19 = vpop.permute.xlu0 %624  ;;  %3098 = vmatprep.mubr.msk.f32.mxu0 %vm228_vm1, %v617_v59  ;;  %v1074_v47 = vpop.permute.xlu1 %1073 }
 0x3d7   :  { %3099 = vmatmul.mubr.msk.f32.vlgmr.msra.gmra.mrb[16].mxu0 %vm228_vm1, %v619_v42 }
 0x3d8   :  { %v629_v55 = vpop.permute.xlu0 %628  ;;  %3101 = vmatprep.mubr.msk.f32.mxu0 %vm228_vm1, %v621_v51  ;;  %v1078_v13 = vpop.permute.xlu1 %1077 }
 0x3da   :  { %3445 = vmatpush3.bf16.xpose.msk.msra.mxu1 %vm4078_vm2, %v3440_v14 }
 0x3db   :  { %3102 = vmatmul.mubr.msk.f32.gmra.mrb[18].mxu0 %vm228_vm1, %v623_v10 }
 0x3dc   :  { %v1068_v24 = vpop.permute.xlu0 %1067  ;;  %3104 = vmatprep.mubr.msk.f32.mxu0 %vm228_vm1, %v625_v19  ;;  %v1082_v36 = vpop.permute.xlu1 %1081 }
 0x3dd   :  { %3154 = vmatprep.mubr.msk.f32.mxu1 %vm228_vm1, %v1068_v24 }
 0x3df   :  { %3105 = vmatmul.mubr.msk.f32.gmra.mrb[20].mxu0 %vm228_vm1, %v627_v3 }
 0x3e0   :  { %v1072_v48 = vpop.permute.xlu0 %1071  ;;  %3107 = vmatprep.mubr.msk.f32.mxu0 %vm228_vm1, %v629_v55 }
 0x3e1   :  { %3155 = vmatmul.mubr.msk.f32.vlgmr.msra.gmra.mrb[8].mxu1 %vm228_vm1, %v1070_v50 }
 0x3e2   :  { %3157 = vmatprep.mubr.msk.f32.mxu1 %vm228_vm1, %v1072_v48 }
 0x3e3   :  { %3108 = vmatmul.mubr.msk.f32.gmra.mrb[22].mxu0 %vm228_vm1, %v631_v15 }
 0x3e4   :  { %v1076_v27 = vpop.permute.xlu0 %1075 }
 0x3e5   :  { %3158 = vmatmul.mubr.msk.f32.gmra.mrb[10].mxu1 %vm228_vm1, %v1074_v47 }
 0x3e6   :  { %3160 = vmatprep.mubr.msk.f32.mxu1 %vm228_vm1, %v1076_v27 }
 0x3e8   :  { %v1080_v35 = vpop.permute.xlu0 %1079 }
 0x3e9   :  { %3161 = vmatmul.mubr.msk.f32.gmra.mrb[12].mxu1 %vm228_vm1, %v1078_v13 }
 0x3ea   :  { %3163 = vmatprep.mubr.msk.f32.mxu1 %vm228_vm1, %v1080_v35 }
 0x3ed   :  { %3164 = vmatmul.mubr.msk.f32.gmra.mrb[14].mxu1 %vm228_vm1, %v1082_v36 }
 0x461   :  { %v3072_v37 = vpop.f32.mrb[8].mxu0 }
 0x462   :  { %609 = vst.msk [vmem:[#allocation2 + $0x8] sm:$0xff] %vm228_vm1, %v3072_v37  ;;  %v569_v39 = vpop.f32.mrb[9].mxu0 }
 0x463   :  { %608 = vst.msk [vmem:[#allocation2] sm:$0xff] %vm228_vm1, %v569_v39 }
 0x495   :  { %v3075_v40 = vpop.f32.mrb[10].mxu0 }
 0x496   :  { %611 = vst.msk [vmem:[#allocation2 + $0x18] sm:$0xff] %vm228_vm1, %v3075_v40  ;;  %v579_v2 = vpop.f32.mrb[11].mxu0 }
 0x497   :  { %610 = vst.msk [vmem:[#allocation2 + $0x10] sm:$0xff] %vm228_vm1, %v579_v2 }
 0x49d   :  { %v3078_v11 = vpop.f32.mrb[12].mxu0 }
 0x49e   :  { %613 = vst.msk [vmem:[#allocation2 + $0x28] sm:$0xff] %vm228_vm1, %v3078_v11  ;;  %v589_v42 = vpop.f32.mrb[13].mxu0 }
 0x49f   :  { %612 = vst.msk [vmem:[#allocation2 + $0x20] sm:$0xff] %vm228_vm1, %v589_v42 }
 0x4a6   :  { %v3081_v43 = vpop.f32.mrb[14].mxu0 }
 0x4a7   :  { %615 = vst.msk [vmem:[#allocation2 + $0x38] sm:$0xff] %vm228_vm1, %v3081_v43  ;;  %v599_v22 = vpop.f32.mrb[15].mxu0 }
 0x4a8   :  { %614 = vst.msk [vmem:[#allocation2 + $0x30] sm:$0xff] %vm228_vm1, %v599_v22 }
 0x4aa   :  { %v3100_v44 = vpop.f32.mrb[16].mxu0 }
 0x4ab   :  { %v746_v46 = vpop.f32.mrb[17].mxu0  ;;  %v4384_v35 = vadd.f32 %v3100_v44, %v4115_v56 }
 0x4ac   :  { %v4381_v13 = vadd.f32 %v746_v46, %v4120_v57 }
 0x4ad   :  { %v788_v40 = vsel %vm366_vm3, %v4384_v35, -inf }
 0x4ae   :  { %v3103_v49 = vpop.f32.mrb[18].mxu0  ;;  %v785_v37 = vsel %vm366_vm3, %v4381_v13, -inf }
 0x4af   :  { %v756_v51 = vpop.f32.mrb[19].mxu0  ;;  %v4387_v36 = vadd.f32 %v3103_v49, %v4127_v62 }
 0x4b2   :  { %v3106_v52 = vpop.f32.mrb[20].mxu0 }
 0x4b3   :  { %v766_v53 = vpop.f32.mrb[21].mxu0  ;;  %v4404_v2 = vadd.f32 %v3106_v52, %v4152_v9 }
 0x4b4   :  { %v3156_v32 = vpop.f32.mrb[8].mxu1  ;;  %v4392_v39 = vadd.f32 %v766_v53, %v4142_v5 }
 0x4b5   :  { %v4339_v54 = vadd.f32 %v3156_v32, %v4115_v56  ;;  %v1197_v58 = vpop.f32.mrb[9].mxu1  ;;  %v794_v56 = vsel %vm366_vm3, %v4387_v36, -inf }
 0x4b6   :  { %v4342_v59 = vadd.f32 %v1197_v58, %v4120_v57  ;;  %v3109_v60 = vpop.f32.mrb[22].mxu0  ;;  %v4397_v57 = vadd.f32 %v756_v51, %v4137_v4 }
 0x4b7   :  { %v776_v41 = vpop.f32.mrb[23].mxu0  ;;  %v1239_v7 = vsel %vm366_vm3, %v4339_v54, -inf  ;;  %v4409_v11 = vadd.f32 %v3109_v60, %v4167_v17 }
 0x4b8   :  { %1240 = vmax.xlane.f32.xlu0 %v1239_v7  ;;  %v3159_v61 = vpop.f32.mrb[10].mxu1  ;;  %v1236_v63 = vsel %vm366_vm3, %v4342_v59, -inf }
 0x4b9   :  { %v4349_v0 = vadd.f32 %v3159_v61, %v4127_v62  ;;  %v1207_v1 = vpop.f32.mrb[11].mxu1  ;;  %1237 = vmax.xlane.f32.xlu1 %v1236_v63  ;;  %v797_v62 = vsel %vm366_vm3, %v4392_v39, -inf  ;;  %v806_v42 = vsel %vm366_vm3, %v4409_v11, -inf }
 0x4ba   :  { %v4352_v3 = vadd.f32 %v1207_v1, %v4137_v4  ;;  %v800_v4 = vsel %vm366_vm3, %v4404_v2, -inf }
 0x4bb   :  { %v1245_v6 = vsel %vm366_vm3, %v4349_v0, -inf }
 0x4bc   :  { %1246 = vmax.xlane.f32.xlu0 %v1245_v6  ;;  %v3162_v8 = vpop.f32.mrb[12].mxu1  ;;  %v1242_v10 = vsel %vm366_vm3, %v4352_v3, -inf }
 0x4bd   :  { %v4359_v45 = vadd.f32 %v3162_v8, %v4152_v9  ;;  %v1217_v14 = vpop.f32.mrb[13].mxu1  ;;  %1243 = vmax.xlane.f32.xlu1 %v1242_v10  ;;  %v4418_v9 = vadd.f32 %v776_v41, %v4187_v29 }
 0x4be   :  { %v4362_v12 = vadd.f32 %v1217_v14, %v4142_v5  ;;  %v791_v5 = vsel %vm366_vm3, %v4397_v57, -inf }
 0x4bf   :  { %v1251_v15 = vsel %vm366_vm3, %v4359_v45, -inf  ;;  %v803_v43 = vsel %vm366_vm3, %v4418_v9, -inf }
 0x4c0   :  { %1252 = vmax.xlane.f32.xlu0 %v1251_v15  ;;  %v3165_v19 = vpop.f32.mrb[14].mxu1  ;;  %v1248_v55 = vsel %vm366_vm3, %v4362_v12, -inf }
 0x4c1   :  { %v4369_v50 = vadd.f32 %v3165_v19, %v4167_v17  ;;  %v1227_v24 = vpop.f32.mrb[15].mxu1  ;;  %1249 = vmax.xlane.f32.xlu1 %v1248_v55 }
 0x4c2   :  { %v4372_v47 = vadd.f32 %v1227_v24, %v4187_v29 }
 0x4c3   :  { %v1257_v48 = vsel %vm366_vm3, %v4369_v50, -inf }
 0x4c4   :  { %1258 = vmax.xlane.f32.xlu0 %v1257_v48  ;;  %v1254_v27 = vsel %vm366_vm3, %v4372_v47, -inf }
 0x4c5   :  { %1255 = vmax.xlane.f32.xlu1 %v1254_v27 }
 0x4d6   :  { %3650 = vrot.lane.b32.xlu1 %v4053_v25, %s3906_s25 }
 0x4da   :  { %3645 = vrot.lane.b32.xlu0 %v4044_v20, %s3906_s25 }
 0x4f9   :  { %786 = vmax.xlane.f32.xlu0 %v785_v37 }
 0x4fa   :  { %789 = vmax.xlane.f32.xlu1 %v788_v40 }
 0x4fd   :  { %795 = vmax.xlane.f32.xlu0 %v794_v56 }
 0x4fe   :  { %798 = vmax.xlane.f32.xlu1 %v797_v62 }
 0x501   :  { %792 = vmax.xlane.f32.xlu0 %v791_v5 }
 0x505   :  { %801 = vmax.xlane.f32.xlu0 %v800_v4 }
 0x509   :  { %807 = vmax.xlane.f32.xlu0 %v806_v42 }
 0x50f   :  { %3660 = vrot.lane.b32.xlu1 %v4071_v34, %s3906_s25 }
 0x51f   :  { %3655 = vrot.lane.b32.xlu0 %v4062_v30, %s3906_s25 }
 0x533   :  { %804 = vmax.xlane.f32.xlu1 %v803_v43 }
 0x545   :  { %v1241_v17 = vpop.xlane.xlu0 %1240 }
 0x546   :  { %v1261_v22 = vsub.f32 %v4339_v54, %v1241_v17  ;;  %v1238_v44 = vpop.xlane.xlu1 %1237 }
 0x547   :  { %v1260_v46 = vsub.f32 %v4342_v59, %v1238_v44 }
 0x548   :  { %v1270_v49 = vmul.f32 1.442695, %v1261_v22 }
 0x549   :  { %v1268_v51 = vmul.f32 1.442695, %v1260_v46  ;;  %v1247_v52 = vpop.xlane.xlu0 %1246 }
 0x54a   :  { %3756 = vpow2.f32 %v1270_v49  ;;  %v1244_v53 = vpop.xlane.xlu1 %1243  ;;  %v1263_v19 = vsub.f32 %v4349_v0, %v1247_v52 }
 0x54b   :  { %3758 = vpow2.f32 %v1268_v51  ;;  %v1262_v24 = vsub.f32 %v4352_v3, %v1244_v53 }
 0x54c   :  { %v1274_v55 = vmul.f32 1.442695, %v1263_v19 }
 0x54d   :  { %v1253_v32 = vpop.xlane.xlu0 %1252  ;;  %v1272_v62 = vmul.f32 1.442695, %v1262_v24 }
 0x54e   :  { %v1250_v58 = vpop.xlane.xlu1 %1249  ;;  %3760 = vpow2.f32 %v1274_v55  ;;  %v1265_v46 = vsub.f32 %v4359_v45, %v1253_v32 }
 0x54f   :  { %v1264_v4 = vsub.f32 %v4362_v12, %v1250_v58 }
 0x550   :  { %v1278_v58 = vmul.f32 1.442695, %v1265_v46 }
 0x551   :  { %v4424_v29 = vpop.xlane.xlu0 %1258 }
 0x552   :  { %v4426_v60 = vpop.xlane.xlu1 %1255 }
 0x554   :  { %v4428_v41 = vpop.eup %3756 }
 0x555   :  { %v4430_v7 = vpop.eup %3758  ;;  %v3646_v54 = vpop.permute.xlu0 %3645  ;;  %v1287_v59 = vsel %vm366_vm3, %v4428_v41, 0.0 }
 0x556   :  { %v3648_v61 = vunpack.i.h.bf16 %v3646_v54  ;;  %v3647_v63 = vunpack.i.l.bf16 %v3646_v54  ;;  %v3651_v1 = vpop.permute.xlu1 %3650  ;;  %1288 = vadd.xlane.f32.xlu1 %v1287_v59  ;;  %v1284_v6 = vsel %vm366_vm3, %v4430_v7, 0.0  ;;  %v1266_v59 = vsub.f32 %v4372_v47, %v4426_v60 }
 0x557   :  { %v3653_v8 = vunpack.i.h.bf16 %v3651_v1  ;;  %v3652_v10 = vunpack.i.l.bf16 %v3651_v1  ;;  %1285 = vadd.xlane.f32.xlu0 %v1284_v6  ;;  %v1267_v47 = vsub.f32 %v4369_v50, %v4424_v29 }
 0x558   :  { %v3406_v14 = vpack.c.bf16 %v3648_v61, %v3647_v63  ;;  %v4442_v27 = vpop.eup %3760  ;;  %v1280_v6 = vmul.f32 1.442695, %v1266_v59 }
 0x559   :  { %v3410_v15 = vpack.c.bf16 %v3653_v8, %v3652_v10  ;;  %v1293_v43 = vsel %vm366_vm3, %v4442_v27, 0.0  ;;  %v1282_v29 = vmul.f32 1.442695, %v1267_v47 }
 0x55a   :  { %3407 = vmatprep.subr.bf16.mxu0 %v3406_v14 }
 0x55b   :  { %3409 = vmatpush3.bf16.msra.mxu0 %v3406_v14 }
 0x55c   :  { %3411 = vmatprep.subr.bf16.mxu0 %v3410_v15 }
 0x55f   :  { %3413 = vmatpush3.bf16.msra.mxu0 %v3410_v15 }
 0x567   :  { %3670 = vrot.lane.b32.xlu1 %v4053_v25, %s3907_s26 }
 0x56d   :  { %3665 = vrot.lane.b32.xlu0 %v4044_v20, %s3907_s26 }
 0x571   :  { %3675 = vrot.lane.b32.xlu0 %v4062_v30, %s3907_s26 }
 0x575   :  { %3680 = vrot.lane.b32.xlu0 %v4071_v34, %s3907_s26 }
 0x586   :  { %v787_v48 = vpop.xlane.xlu0 %786 }
 0x587   :  { %v809_v37 = vsub.f32 %v4381_v13, %v787_v48  ;;  %v790_v40 = vpop.xlane.xlu1 %789 }
 0x588   :  { %v810_v56 = vsub.f32 %v4384_v35, %v790_v40  ;;  %v1276_v35 = vmul.f32 1.442695, %v1264_v4 }
 0x589   :  { %v817_v5 = vmul.f32 1.442695, %v809_v37 }
 0x58a   :  { %v819_v42 = vmul.f32 1.442695, %v810_v56  ;;  %v796_v0 = vpop.xlane.xlu0 %795 }
 0x58b   :  { %3762 = vpow2.f32 %v817_v5  ;;  %v812_v3 = vsub.f32 %v4387_v36, %v796_v0  ;;  %1294 = vadd.xlane.f32.xlu1 %v1293_v43  ;;  %v799_v17 = vpop.xlane.xlu1 %798 }
 0x58c   :  { %3764 = vpow2.f32 %v819_v42  ;;  %v813_v22 = vsub.f32 %v4392_v39, %v799_v17 }
 0x58d   :  { %3766 = vpow2.f32 %v1272_v62  ;;  %v823_v13 = vmul.f32 1.442695, %v812_v3 }
 0x58e   :  { %v793_v44 = vpop.xlane.xlu0 %792  ;;  %v825_v49 = vmul.f32 1.442695, %v813_v22 }
 0x58f   :  { %3768 = vpow2.f32 %v823_v13  ;;  %v811_v12 = vsub.f32 %v4397_v57, %v793_v44  ;;  %v3661_v61 = vpop.permute.xlu1 %3660 }
 0x590   :  { %3770 = vpow2.f32 %v1276_v35  ;;  %v3663_v8 = vunpack.i.h.bf16 %v3661_v61  ;;  %v3662_v15 = vunpack.i.l.bf16 %v3661_v61 }
 0x591   :  { %v821_v51 = vmul.f32 1.442695, %v811_v12 }
 0x592   :  { %v802_v52 = vpop.xlane.xlu0 %801  ;;  %v3418_v62 = vpack.c.bf16 %v3663_v8, %v3662_v15 }
 0x593   :  { %3772 = vpow2.f32 %v821_v51  ;;  %v814_v36 = vsub.f32 %v4404_v2, %v802_v52 }
 0x594   :  { %3774 = vpow2.f32 %v825_v49 }
 0x595   :  { %v4454_v53 = vpop.eup %3762  ;;  %v827_v54 = vmul.f32 1.442695, %v814_v36 }
 0x596   :  { %v4456_v39 = vpop.eup %3764  ;;  %v808_v57 = vpop.xlane.xlu0 %807  ;;  %v833_v45 = vsel %vm366_vm3, %v4454_v53, 0.0 }
 0x597   :  { %v4462_v32 = vpop.eup %3766  ;;  %3776 = vpow2.f32 %v827_v54  ;;  %v816_v2 = vsub.f32 %v4409_v11, %v808_v57  ;;  %834 = vadd.xlane.f32.xlu1 %v833_v45  ;;  %v836_v63 = vsel %vm366_vm3, %v4456_v39, 0.0 }
 0x598   :  { %837 = vadd.xlane.f32.xlu0 %v836_v63  ;;  %3778 = vpow2.f32 %v1278_v58  ;;  %v1290_v11 = vsel %vm366_vm3, %v4462_v32, 0.0 }
 0x599   :  { %v4467_v1 = vpop.eup %3768  ;;  %v831_v60 = vmul.f32 1.442695, %v816_v2 }
 0x59a   :  { %v3656_v10 = vpop.permute.xlu0 %3655  ;;  %v842_v14 = vsel %vm366_vm3, %v4467_v1, 0.0  ;;  %v4475_v24 = vpop.eup %3770 }
 0x59b   :  { %3780 = vpow2.f32 %v831_v60  ;;  %v3658_v19 = vunpack.i.h.bf16 %v3656_v10  ;;  %v3657_v55 = vunpack.i.l.bf16 %v3656_v10  ;;  %843 = vadd.xlane.f32.xlu1 %v842_v14  ;;  %v1296_v56 = vsel %vm366_vm3, %v4475_v24, 0.0 }
 0x59c   :  { %1291 = vadd.xlane.f32.xlu0 %v1290_v11  ;;  %3782 = vpow2.f32 %v1280_v6 }
 0x59d   :  { %v4477_v48 = vpop.eup %3772  ;;  %v3414_v50 = vpack.c.bf16 %v3658_v19, %v3657_v55  ;;  %3784 = vpow2.f32 %v1282_v29 }
 0x59e   :  { %v839_v37 = vsel %vm366_vm3, %v4477_v48, 0.0  ;;  %v4481_v40 = vpop.eup %3774 }
 0x59f   :  { %840 = vadd.xlane.f32.xlu1 %v839_v37  ;;  %3415 = vmatprep.subr.bf16.mxu0 %v3414_v50  ;;  %v845_v4 = vsel %vm366_vm3, %v4481_v40, 0.0 }
 0x5a0   :  { %1297 = vadd.xlane.f32.xlu0 %v1296_v56  ;;  %3417 = vmatpush3.bf16.msra.mxu0 %v3414_v50 }
 0x5a1   :  { %v4485_v5 = vpop.eup %3776  ;;  %3419 = vmatprep.subr.bf16.mxu0 %v3418_v62 }
 0x5a2   :  { %v848_v42 = vsel %vm366_vm3, %v4485_v5, 0.0  ;;  %v4491_v0 = vpop.eup %3778 }
 0x5a3   :  { %846 = vadd.xlane.f32.xlu1 %v845_v4  ;;  %v1299_v17 = vsel %vm366_vm3, %v4491_v0, 0.0 }
 0x5a4   :  { %849 = vadd.xlane.f32.xlu0 %v848_v42  ;;  %3421 = vmatpush3.bf16.msra.mxu0 %v3418_v62 }
 0x5a5   :  { %v4493_v43 = vpop.eup %3780 }
 0x5a6   :  { %v854_v3 = vsel %vm366_vm3, %v4493_v43, 0.0  ;;  %v4499_v13 = vpop.eup %3782 }
 0x5a7   :  { %855 = vadd.xlane.f32.xlu1 %v854_v3  ;;  %v1302_v22 = vsel %vm366_vm3, %v4499_v13, 0.0  ;;  %v4503_v35 = vpop.eup %3784 }
 0x5a8   :  { %1300 = vadd.xlane.f32.xlu0 %v1299_v17  ;;  %v1305_v44 = vsel %vm366_vm3, %v4503_v35, 0.0 }
 0x5ac   :  { %1303 = vadd.xlane.f32.xlu0 %v1302_v22 }
 0x5b0   :  { %1306 = vadd.xlane.f32.xlu0 %v1305_v44 }
 0x5c0   :  { %v805_v12 = vpop.xlane.xlu1 %804 }
 0x5c1   :  { %v815_v46 = vsub.f32 %v4418_v9, %v805_v12 }
 0x5c3   :  { %v829_v49 = vmul.f32 1.442695, %v815_v46 }
 0x5c5   :  { %3786 = vpow2.f32 %v829_v49 }
 0x5c6   :  { %3690 = vrot.lane.b32.xlu0 %v4053_v25, %s3908_s1 }
 0x5ca   :  { %1522 = vrot.lane.b32.xlu0 %v4049_v23, %s3909_s27 }
 0x5ce   :  { %1526 = vrot.lane.b32.xlu0 %v4057_v28, %s3909_s27 }
 0x5cf   :  { %v4511_v51 = vpop.eup %3786 }
 0x5d0   :  { %v851_v52 = vsel %vm366_vm3, %v4511_v51, 0.0 }
 0x5d1   :  { %852 = vadd.xlane.f32.xlu1 %v851_v52 }
 0x5d2   :  { %1530 = vrot.lane.b32.xlu0 %v4066_v33, %s3909_s27 }
 0x5e2   :  { %3685 = vrot.lane.b32.xlu1 %v4044_v20, %s3908_s1 }
 0x5e3   :  { %v1289_v28 = vpop.xlane.xlu1 %1288 }
 0x5e4   :  { %v4517_v9 = vpop.xlane.xlu0 %1285 }
 0x5e6   :  { %3695 = vrot.lane.b32.xlu1 %v4062_v30, %s3908_s1 }
 0x5e7   :  { %v3671_v59 = vpop.permute.xlu1 %3670 }
 0x5e8   :  { %v3666_v36 = vpop.permute.xlu0 %3665  ;;  %v3672_v60 = vunpack.i.l.bf16 %v3671_v59 }
 0x5e9   :  { %v3668_v58 = vunpack.i.h.bf16 %v3666_v36  ;;  %v3667_v54 = vunpack.i.l.bf16 %v3666_v36 }
 0x5ea   :  { %3700 = vrot.lane.b32.xlu1 %v4071_v34, %s3908_s1  ;;  %s3910_s1 = smov 40  }
 0x5eb   :  { %v3446_v23 = vpack.c.bf16 %v3668_v58, %v3667_v54 }
 0x5ec   :  { %v3676_v33 = vpop.permute.xlu0 %3675 }
 0x5ed   :  { %3447 = vmatprep.subr.bf16.mxu0 %v3446_v23  ;;  %v3678_v11 = vunpack.i.h.bf16 %v3676_v33  ;;  %v3677_v15 = vunpack.i.l.bf16 %v3676_v33 }
 0x5ee   :  { %1518 = vrot.lane.b32.xlu1 %v4038_v18, %s3909_s27 }
 0x5ef   :  { %v3454_v56 = vpack.c.bf16 %v3678_v11, %v3677_v15 }
 0x5f0   :  { %v3681_v45 = vpop.permute.xlu0 %3680 }
 0x5f1   :  { %v3683_v29 = vunpack.i.h.bf16 %v3681_v45  ;;  %v3682_v37 = vunpack.i.l.bf16 %v3681_v45 }
 0x5f2   :  { %1520 = vrot.lane.b32.xlu1 %v4036_v16, %s3909_s27 }
 0x5f3   :  { %v3458_v4 = vpack.c.bf16 %v3683_v29, %v3682_v37 }
 0x5f6   :  { %1524 = vrot.lane.b32.xlu1 %v4046_v21, %s3909_s27 }
 0x5fa   :  { %1528 = vrot.lane.b32.xlu1 %v4055_v26, %s3909_s27  ;;  %v3673_v26 = vunpack.i.h.bf16 %v3671_v59 }
 0x5fc   :  { %v3450_v19 = vpack.c.bf16 %v3673_v26, %v3672_v60 }
 0x5fe   :  { %1532 = vrot.lane.b32.xlu1 %v4064_v31, %s3909_s27  ;;  %s3912_s27 = smov 16  }
 0x618   :  { %v4526_v57 = vpop.xlane.xlu1 %1294 }
 0x624   :  { %v835_v61 = vpop.xlane.xlu1 %834 }
 0x625   :  { %3788 = vrcp.f32 %v835_v61  ;;  %v838_v2 = vpop.xlane.xlu0 %837 }
 0x626   :  { %3790 = vrcp.f32 %v838_v2 }
 0x628   :  { %v844_v63 = vpop.xlane.xlu1 %843 }
 0x629   :  { %v1292_v18 = vpop.xlane.xlu0 %1291  ;;  %3792 = vrcp.f32 %v844_v63 }
 0x62c   :  { %v841_v16 = vpop.xlane.xlu1 %840 }
 0x62d   :  { %3794 = vrcp.f32 %v841_v16  ;;  %v1298_v21 = vpop.xlane.xlu0 %1297 }
 0x62f   :  { %v3789_v47 = vpop.eup %3788 }
 0x630   :  { %v3791_v31 = vpop.eup %3790  ;;  %v847_v6 = vpop.xlane.xlu1 %846  ;;  %v858_v8 = vmul.f32 %v3789_v47, %v4454_v53 }
 0x631   :  { %v860_v10 = vmul.f32 %v3791_v31, %v4456_v39  ;;  %3796 = vrcp.f32 %v847_v6  ;;  %v850_v14 = vpop.xlane.xlu0 %849 }
 0x632   :  { %3798 = vrcp.f32 %v850_v14  ;;  %3126 = vmatprep.mubr.msk.f32.mxu0 %vm366_vm3, %v858_v8 }
 0x633   :  { %3127 = vmatmul.mubr.msk.f32.vlgmr.msra.gmra.mrb[24].mxu0 %vm366_vm3, %v860_v10  ;;  %v3793_v55 = vpop.eup %3792  ;;  %3800 = vrcp.f32 %v4517_v9 }
 0x634   :  { %3449 = vmatpush3.bf16.msra.mxu0 %v3446_v23  ;;  %v864_v39 = vmul.f32 %v3793_v55, %v4467_v1  ;;  %v856_v1 = vpop.xlane.xlu1 %855 }
 0x635   :  { %3451 = vmatprep.subr.bf16.mxu0 %v3450_v19  ;;  %3802 = vrcp.f32 %v856_v1 }
 0x637   :  { %v3795_v50 = vpop.eup %3794 }
 0x638   :  { %3453 = vmatpush3.bf16.msra.mxu0 %v3450_v19  ;;  %v862_v53 = vmul.f32 %v3795_v50, %v4477_v48  ;;  %v1301_v48 = vpop.xlane.xlu0 %1300 }
 0x639   :  { %3455 = vmatprep.subr.bf16.mxu0 %v3454_v56 }
 0x63a   :  { %3129 = vmatprep.mubr.msk.f32.mxu0 %vm366_vm3, %v862_v53 }
 0x63b   :  { %v3797_v62 = vpop.eup %3796  ;;  %3130 = vmatmul.mubr.msk.f32.gmra.mrb[26].mxu0 %vm366_vm3, %v864_v39 }
 0x63c   :  { %v3799_v42 = vpop.eup %3798  ;;  %3457 = vmatpush3.bf16.msra.mxu0 %v3454_v56  ;;  %v866_v3 = vmul.f32 %v3797_v62, %v4481_v40  ;;  %v1304_v22 = vpop.xlane.xlu0 %1303 }
 0x63d   :  { %3459 = vmatprep.subr.bf16.mxu0 %v3458_v4  ;;  %v868_v17 = vmul.f32 %v3799_v42, %v4485_v5  ;;  %v3801_v52 = vpop.eup %3800 }
 0x63e   :  { %3132 = vmatprep.mubr.msk.f32.mxu0 %vm366_vm3, %v866_v3  ;;  %v1309_v33 = vmul.f32 %v3801_v52, %v4430_v7  ;;  %v3885_v52 = vld [vmem:[%s5058_s3] sm:$0xff] }
 0x63f   :  { %3133 = vmatmul.mubr.msk.f32.gmra.mrb[28].mxu0 %vm366_vm3, %v868_v17  ;;  %v3803_v36 = vpop.eup %3802 }
 0x640   :  { %3461 = vmatpush3.bf16.msra.mxu0 %v3458_v4  ;;  %v1307_v49 = vpop.xlane.xlu0 %1306  ;;  %v872_v23 = vmul.f32 %v3803_v36, %v4493_v43 }
 0x644   :  { %v3691_v58 = vpop.permute.xlu0 %3690 }
 0x645   :  { %v3692_v45 = vunpack.i.l.bf16 %v3691_v58 }
 0x648   :  { %v1523_v11 = vpop.permute.xlu0 %1522 }
 0x64c   :  { %v1527_v15 = vpop.permute.xlu0 %1526 }
 0x650   :  { %v1531_v55 = vpop.permute.xlu0 %1530 }
 0x65e   :  { %v853_v44 = vpop.xlane.xlu1 %852 }
 0x65f   :  { %3804 = vrcp.f32 %v853_v44 }
 0x660   :  { %3806 = vrcp.f32 %v1289_v28 }
 0x661   :  { %3808 = vrcp.f32 %v1292_v18 }
 0x662   :  { %v3686_v12 = vpop.permute.xlu1 %3685  ;;  %3810 = vrcp.f32 %v4526_v57  ;;  %v3693_v57 = vunpack.i.h.bf16 %v3691_v58 }
 0x663   :  { %v3688_v40 = vunpack.i.h.bf16 %v3686_v12  ;;  %v3687_v46 = vunpack.i.l.bf16 %v3686_v12  ;;  %3812 = vrcp.f32 %v1298_v21 }
 0x664   :  { %3814 = vrcp.f32 %v1301_v48  ;;  %v3468_v43 = vpack.c.bf16 %v3693_v57, %v3692_v45 }
 0x665   :  { %v3462_v5 = vpack.c.bf16 %v3688_v40, %v3687_v46  ;;  %3816 = vrcp.f32 %v1304_v22  ;;  %v3884_v46 = vld [vmem:[%s5058_s3 + $0x8] sm:$0xff] }
 0x666   :  { %3818 = vrcp.f32 %v1307_v49  ;;  %v3696_v18 = vpop.permute.xlu1 %3695 }
 0x667   :  { %3464 = vmatprep.subr.msk.bf16.mxu0 %vm4078_vm2, %v3462_v5  ;;  %v3697_v47 = vunpack.i.l.bf16 %v3696_v18 }
 0x669   :  { %v3805_v9 = vpop.eup %3804 }
 0x66a   :  { %v870_v54 = vmul.f32 %v3805_v9, %v4511_v51  ;;  %v3807_v28 = vpop.eup %3806  ;;  %v3701_v26 = vpop.permute.xlu1 %3700 }
 0x66b   :  { %v3809_v59 = vpop.eup %3808  ;;  %v1311_v61 = vmul.f32 %v3807_v28, %v4428_v41  ;;  %v3702_v10 = vunpack.i.l.bf16 %v3701_v26  ;;  %v3886_v28 = vld [vmem:[%s5058_s3 + $0x10] sm:$0xff] }
 0x66c   :  { %3135 = vmatprep.mubr.msk.f32.mxu0 %vm366_vm3, %v870_v54  ;;  %v3811_v2 = vpop.eup %3810  ;;  %v1313_v51 = vmul.f32 %v3809_v59, %v4462_v32  ;;  %v3698_v32 = vunpack.i.h.bf16 %v3696_v18  ;;  %v3887_v59 = vld [vmem:[%s5058_s3 + $0x18] sm:$0xff] }
 0x66d   :  { %3136 = vmatmul.mubr.msk.f32.gmra.mrb[30].mxu0 %vm366_vm3, %v872_v23  ;;  %v3813_v63 = vpop.eup %3812  ;;  %v1315_v7 = vmul.f32 %v3811_v2, %v4442_v27 }
 0x66e   :  { %3182 = vmatprep.mubr.msk.f32.mxu0 %vm366_vm3, %v1309_v33  ;;  %v3815_v16 = vpop.eup %3814  ;;  %v1317_v41 = vmul.f32 %v3813_v63, %v4475_v24  ;;  %v3474_v8 = vpack.c.bf16 %v3698_v32, %v3697_v47  ;;  %v3703_v24 = vunpack.i.h.bf16 %v3701_v26  ;;  %v1519_v14 = vpop.permute.xlu1 %1518  ;;  %v3890_v32 = vld [vmem:[%s5058_s3 + $0x30] sm:$0xff]  ;;  %v3891_v26 = vld [vmem:[%s5058_s3 + $0x38] sm:$0xff] }
 0x66f   :  { %v3817_v21 = vpop.eup %3816  ;;  %v1319_v60 = vmul.f32 %v3815_v16, %v4491_v0 }
 0x670   :  { %v3819_v31 = vpop.eup %3818  ;;  %v1321_v6 = vmul.f32 %v3817_v21, %v4499_v13  ;;  %v3480_v0 = vpack.c.bf16 %v3703_v24, %v3702_v10 }
 0x671   :  { %3183 = vmatmul.mubr.msk.f32.vlgmr.msra.gmra.mrb[32].mxu0 %vm366_vm3, %v1311_v61  ;;  %v1323_v27 = vmul.f32 %v3819_v31, %v4503_v35 }
 0x672   :  { %3467 = vmatpush3.bf16.xpose.msk.msra.mxu0 %vm4078_vm2, %v3462_v5  ;;  %3185 = vmatprep.mubr.msk.f32.mxu0 %vm366_vm3, %v1313_v51  ;;  %v1521_v13 = vpop.permute.xlu1 %1520  ;;  %v3888_v51 = vld [vmem:[%s5058_s3 + $0x20] sm:$0xff] }
 0x673   :  { %3470 = vmatprep.subr.msk.bf16.mxu0 %vm4078_vm2, %v3468_v43 }
 0x675   :  { %3186 = vmatmul.mubr.msk.f32.gmra.mrb[34].mxu0 %vm366_vm3, %v1315_v7 }
 0x676   :  { %3188 = vmatprep.mubr.msk.f32.mxu0 %vm366_vm3, %v1317_v41  ;;  %v1525_v35 = vpop.permute.xlu1 %1524 }
 0x679   :  { %3189 = vmatmul.mubr.msk.f32.gmra.mrb[36].mxu0 %vm366_vm3, %v1319_v60 }
 0x67a   :  { %3473 = vmatpush3.bf16.xpose.msk.msra.mxu0 %vm4078_vm2, %v3468_v43  ;;  %3191 = vmatprep.mubr.msk.f32.mxu0 %vm366_vm3, %v1321_v6  ;;  %v1529_v19 = vpop.permute.xlu1 %1528  ;;  %v3889_v43 = vld [vmem:[%s5058_s3 + $0x28] sm:$0xff]  ;;  %s3911_s3 = smov 8  }
 0x67b   :  { %3476 = vmatprep.subr.msk.bf16.mxu0 %vm4078_vm2, %v3474_v8 }
 0x67d   :  { %3192 = vmatmul.mubr.msk.f32.gmra.mrb[38].mxu0 %vm366_vm3, %v1323_v27 }
 0x67e   :  { %3210 = vmatprep.mubr.msk.f32.mxu0 %vm228_vm1, %v1519_v14  ;;  %v1533_v50 = vpop.permute.xlu1 %1532 }
 0x682   :  { %3479 = vmatpush3.bf16.xpose.msk.msra.mxu0 %vm4078_vm2, %v3474_v8 }
 0x683   :  { %3482 = vmatprep.subr.msk.bf16.mxu0 %vm4078_vm2, %v3480_v0 }
 0x68a   :  { %3485 = vmatpush3.bf16.xpose.msk.msra.mxu0 %vm4078_vm2, %v3480_v0 }
 0x691   :  { %3211 = vmatmul.mubr.msk.f32.vlgmr.msra.gmra.mrb[40].mxu0 %vm228_vm1, %v1521_v13 }
 0x692   :  { %3213 = vmatprep.mubr.msk.f32.mxu0 %vm228_vm1, %v1523_v11 }
 0x695   :  { %3214 = vmatmul.mubr.msk.f32.gmra.mrb[42].mxu0 %vm228_vm1, %v1525_v35 }
 0x696   :  { %3216 = vmatprep.mubr.msk.f32.mxu0 %vm228_vm1, %v1527_v15 }
 0x699   :  { %3217 = vmatmul.mubr.msk.f32.gmra.mrb[44].mxu0 %vm228_vm1, %v1529_v19 }
 0x69a   :  { %3219 = vmatprep.mubr.msk.f32.mxu0 %vm228_vm1, %v1531_v55 }
 0x69d   :  { %3220 = vmatmul.mubr.msk.f32.gmra.mrb[46].mxu0 %vm228_vm1, %v1533_v50 }
 0x706   :  { %v4586_v38 = vpop.f32.mrb[24].mxu0 }
 0x707   :  { %v4588_v29 = vpop.f32.mrb[25].mxu0 }
 0x70e   :  { %v4590_v37 = vpop.f32.mrb[26].mxu0 }
 0x70f   :  { %v4592_v56 = vpop.f32.mrb[27].mxu0 }
 0x712   :  { %v4594_v53 = vpop.f32.mrb[28].mxu0 }
 0x713   :  { %v4596_v39 = vpop.f32.mrb[29].mxu0 }
 0x740   :  { %v4598_v62 = vpop.f32.mrb[30].mxu0 }
 0x741   :  { %v4600_v4 = vpop.f32.mrb[31].mxu0 }
 0x744   :  { %v4602_v42 = vpop.f32.mrb[32].mxu0 }
 0x745   :  { %v4604_v3 = vpop.f32.mrb[33].mxu0 }
 0x748   :  { %v4606_v17 = vpop.f32.mrb[34].mxu0 }
 0x749   :  { %v4608_v48 = vpop.f32.mrb[35].mxu0 }
 0x74c   :  { %v4610_v1 = vpop.f32.mrb[36].mxu0 }
 0x74d   :  { %v4612_v22 = vpop.f32.mrb[37].mxu0 }
 0x750   :  { %v4614_v44 = vpop.f32.mrb[38].mxu0 }
 0x751   :  { %v4616_v12 = vpop.f32.mrb[39].mxu0 }
 0x764   :  { %v3212_v40 = vpop.f32.mrb[40].mxu0 }
 0x765   :  { %v1654_v49 = vadd.f32 %v3884_v46, %v3212_v40  ;;  %v1648_v5 = vpop.f32.mrb[41].mxu0 }
 0x766   :  { %v1649_v36 = vadd.f32 %v3885_v52, %v1648_v5 }
 0x767   :  { %v1690_v9 = vsel %vm366_vm3, %v1654_v49, -inf }
 0x768   :  { %1691 = vmax.xlane.f32.xlu1 %v1690_v9  ;;  %v3215_v58 = vpop.f32.mrb[42].mxu0  ;;  %v1687_v54 = vsel %vm366_vm3, %v1649_v36, -inf }
 0x769   :  { %v1658_v23 = vpop.f32.mrb[43].mxu0  ;;  %1688 = vmax.xlane.f32.xlu0 %v1687_v54  ;;  %v1664_v57 = vadd.f32 %v3887_v59, %v3215_v58 }
 0x76a   :  { %v1659_v33 = vadd.f32 %v3886_v28, %v1658_v23 }
 0x76b   :  { %v1696_v41 = vsel %vm366_vm3, %v1664_v57, -inf }
 0x76c   :  { %v3218_v45 = vpop.f32.mrb[44].mxu0  ;;  %v1693_v61 = vsel %vm366_vm3, %v1659_v33, -inf }
 0x76d   :  { %v1668_v2 = vpop.f32.mrb[45].mxu0  ;;  %1694 = vmax.xlane.f32.xlu0 %v1693_v61  ;;  %v1674_v18 = vadd.f32 %v3889_v43, %v3218_v45 }
 0x76e   :  { %v1669_v63 = vadd.f32 %v3888_v51, %v1668_v2 }
 0x76f   :  { %v1702_v6 = vsel %vm366_vm3, %v1674_v18, -inf }
 0x770   :  { %v3221_v7 = vpop.f32.mrb[46].mxu0  ;;  %v1699_v16 = vsel %vm366_vm3, %v1669_v63, -inf }
 0x771   :  { %v1678_v21 = vpop.f32.mrb[47].mxu0  ;;  %1700 = vmax.xlane.f32.xlu1 %v1699_v16  ;;  %1697 = vmax.xlane.f32.xlu0 %v1696_v41  ;;  %v1684_v60 = vadd.f32 %v3891_v26, %v3221_v7 }
 0x772   :  { %v1679_v47 = vadd.f32 %v3890_v32, %v1678_v21 }
 0x773   :  { %v1708_v8 = vsel %vm366_vm3, %v1684_v60, -inf }
 0x774   :  { %v1705_v31 = vsel %vm366_vm3, %v1679_v47, -inf }
 0x775   :  { %1706 = vmax.xlane.f32.xlu1 %v1705_v31  ;;  %1703 = vmax.xlane.f32.xlu0 %v1702_v6 }
 0x779   :  { %1709 = vmax.xlane.f32.xlu0 %v1708_v8 }
 0x786   :  { %3705 = vrot.lane.b32.xlu1 %v4044_v20, %s3910_s1 }
 0x7f5   :  { %v1692_v27 = vpop.xlane.xlu1 %1691 }
 0x7f6   :  { %v1712_v24 = vsub.f32 %v1654_v49, %v1692_v27  ;;  %v1689_v10 = vpop.xlane.xlu0 %1688 }
 0x7f7   :  { %v1711_v14 = vsub.f32 %v1649_v36, %v1689_v10 }
 0x7f8   :  { %v1721_v0 = vmul.f32 1.442695, %v1712_v24 }
 0x7f9   :  { %v1719_v13 = vmul.f32 1.442695, %v1711_v14 }
 0x7fa   :  { %3820 = vpow2.f32 %v1721_v0  ;;  %v1695_v11 = vpop.xlane.xlu0 %1694 }
 0x7fb   :  { %3822 = vpow2.f32 %v1719_v13  ;;  %v1713_v35 = vsub.f32 %v1659_v33, %v1695_v11 }
 0x7fd   :  { %v1723_v15 = vmul.f32 1.442695, %v1713_v35 }
 0x7fe   :  { %v1701_v19 = vpop.xlane.xlu1 %1700  ;;  %v1698_v55 = vpop.xlane.xlu0 %1697 }
 0x7ff   :  { %3824 = vpow2.f32 %v1723_v15  ;;  %v1715_v50 = vsub.f32 %v1669_v63, %v1701_v19  ;;  %v1714_v40 = vsub.f32 %v1664_v57, %v1698_v55 }
 0x801   :  { %v1727_v46 = vmul.f32 1.442695, %v1715_v50  ;;  %v1725_v5 = vmul.f32 1.442695, %v1714_v40 }
 0x802   :  { %v1707_v52 = vpop.xlane.xlu1 %1706  ;;  %v1704_v20 = vpop.xlane.xlu0 %1703 }
 0x803   :  { %3826 = vpow2.f32 %v1727_v46  ;;  %v1716_v49 = vsub.f32 %v1674_v18, %v1704_v20  ;;  %v1717_v23 = vsub.f32 %v1679_v47, %v1707_v52 }
 0x804   :  { %v4652_v9 = vpop.eup %3820  ;;  %3828 = vpow2.f32 %v1725_v5 }
 0x805   :  { %v4654_v36 = vpop.eup %3822  ;;  %v1729_v58 = vmul.f32 1.442695, %v1716_v49  ;;  %v1738_v54 = vsel %vm366_vm3, %v4652_v9, 0.0  ;;  %v1731_v43 = vmul.f32 1.442695, %v1717_v23 }
 0x806   :  { %v3706_v28 = vpop.permute.xlu1 %3705  ;;  %1739 = vadd.xlane.f32.xlu0 %v1738_v54  ;;  %v1710_v33 = vpop.xlane.xlu0 %1709  ;;  %v1735_v59 = vsel %vm366_vm3, %v4654_v36, 0.0 }
 0x807   :  { %v3708_v57 = vunpack.i.h.bf16 %v3706_v28  ;;  %v3707_v45 = vunpack.i.l.bf16 %v3706_v28  ;;  %v1718_v61 = vsub.f32 %v1684_v60, %v1710_v33  ;;  %1736 = vadd.xlane.f32.xlu1 %v1735_v59  ;;  %3830 = vpow2.f32 %v1729_v58 }
 0x809   :  { %v4660_v2 = vpop.eup %3824  ;;  %v3486_v51 = vpack.c.bf16 %v3708_v57, %v3707_v45  ;;  %v1733_v63 = vmul.f32 1.442695, %v1718_v61 }
 0x80a   :  { %v1741_v18 = vsel %vm366_vm3, %v4660_v2, 0.0 }
 0x80b   :  { %3832 = vpow2.f32 %v1733_v63  ;;  %3487 = vmatprep.subr.bf16.mxu1 %v3486_v51  ;;  %1742 = vadd.xlane.f32.xlu1 %v1741_v18  ;;  %v1978_v18 = vld [vmem:[%s5059_s4 + $0x8] sm:$0xff] }
 0x80c   :  { %3489 = vmatpush3.bf16.msra.mxu1 %v3486_v51  ;;  %3834 = vpow2.f32 %v1731_v43  ;;  %v1977_v43 = vld [vmem:[%s5059_s4] sm:$0xff] }
 0x80d   :  { %v4664_v7 = vpop.eup %3826 }
 0x80e   :  { %v4666_v16 = vpop.eup %3828  ;;  %v1747_v41 = vsel %vm366_vm3, %v4664_v7, 0.0 }
 0x80f   :  { %1748 = vadd.xlane.f32.xlu1 %v1747_v41  ;;  %v1744_v21 = vsel %vm366_vm3, %v4666_v16, 0.0  ;;  %v1980_v41 = vld [vmem:[%s5059_s4 + $0x18] sm:$0xff] }
 0x810   :  { %1745 = vadd.xlane.f32.xlu0 %v1744_v21 }
 0x811   :  { %v4672_v32 = vpop.eup %3830 }
 0x812   :  { %v1750_v47 = vsel %vm366_vm3, %v4672_v32, 0.0 }
 0x814   :  { %1751 = vadd.xlane.f32.xlu0 %v1750_v47 }
 0x815   :  { %v4676_v26 = vpop.eup %3832 }
 0x816   :  { %v1756_v60 = vsel %vm366_vm3, %v4676_v26, 0.0  ;;  %v4680_v31 = vpop.eup %3834 }
 0x817   :  { %v1753_v6 = vsel %vm366_vm3, %v4680_v31, 0.0 }
 0x818   :  { %1757 = vadd.xlane.f32.xlu0 %v1756_v60 }
 0x81c   :  { %1754 = vadd.xlane.f32.xlu0 %v1753_v6 }
 0x820   :  { %3715 = vrot.lane.b32.xlu1 %v4062_v30, %s3910_s1 }
 0x824   :  { %3720 = vrot.lane.b32.xlu1 %v4071_v34, %s3910_s1 }
 0x828   :  { %1034 = vrot.lane.b32.xlu1 %v4588_v29, %s3911_s3 }
 0x82c   :  { %1036 = vrot.lane.b32.xlu1 %v4586_v38, %s3911_s3 }
 0x830   :  { %1487 = vrot.lane.b32.xlu1 %v4602_v42, %s3912_s27 }
 0x832   :  { %3710 = vrot.lane.b32.xlu0 %v4053_v25, %s3910_s1 }
 0x834   :  { %1040 = vrot.lane.b32.xlu1 %v4590_v37, %s3911_s3 }
 0x836   :  { %1485 = vrot.lane.b32.xlu0 %v4604_v3, %s3912_s27 }
 0x838   :  { %1491 = vrot.lane.b32.xlu1 %v4606_v17, %s3912_s27 }
 0x83a   :  { %1038 = vrot.lane.b32.xlu0 %v4592_v56, %s3911_s3 }
 0x83c   :  { %1044 = vrot.lane.b32.xlu1 %v4594_v53, %s3911_s3 }
 0x83e   :  { %1489 = vrot.lane.b32.xlu0 %v4608_v48, %s3912_s27 }
 0x840   :  { %1495 = vrot.lane.b32.xlu1 %v4610_v1, %s3912_s27 }
 0x842   :  { %1042 = vrot.lane.b32.xlu0 %v4596_v39, %s3911_s3 }
 0x844   :  { %1048 = vrot.lane.b32.xlu1 %v4598_v62, %s3911_s3 }
 0x846   :  { %1493 = vrot.lane.b32.xlu0 %v4612_v22, %s3912_s27 }
 0x848   :  { %1499 = vrot.lane.b32.xlu1 %v4614_v44, %s3912_s27 }
 0x84a   :  { %1046 = vrot.lane.b32.xlu0 %v4600_v4, %s3911_s3 }
 0x84e   :  { %1497 = vrot.lane.b32.xlu0 %v4616_v12, %s3912_s27 }
 0x893   :  { %v1740_v34 = vpop.xlane.xlu0 %1739 }
 0x894   :  { %v1737_v25 = vpop.xlane.xlu1 %1736 }
 0x895   :  { %3836 = vrcp.f32 %v1737_v25 }
 0x896   :  { %3838 = vrcp.f32 %v1740_v34 }
 0x898   :  { %v1743_v30 = vpop.xlane.xlu1 %1742 }
 0x899   :  { %3840 = vrcp.f32 %v1743_v30 }
 0x89c   :  { %v1749_v38 = vpop.xlane.xlu1 %1748 }
 0x89d   :  { %v1746_v29 = vpop.xlane.xlu0 %1745 }
 0x89e   :  { %3842 = vrcp.f32 %v1746_v29 }
 0x89f   :  { %v3837_v37 = vpop.eup %3836  ;;  %3844 = vrcp.f32 %v1749_v38 }
 0x8a0   :  { %v3716_v56 = vpop.permute.xlu1 %3715  ;;  %v1760_v53 = vmul.f32 %v3837_v37, %v4654_v36  ;;  %v3839_v19 = vpop.eup %3838 }
 0x8a1   :  { %v1752_v39 = vpop.xlane.xlu0 %1751  ;;  %v3718_v1 = vunpack.i.h.bf16 %v3716_v56  ;;  %v3717_v22 = vunpack.i.l.bf16 %v3716_v56  ;;  %v1762_v40 = vmul.f32 %v3839_v19, %v4652_v9 }
 0x8a2   :  { %3238 = vmatprep.mubr.msk.f32.mxu1 %vm366_vm3, %v1760_v53  ;;  %3846 = vrcp.f32 %v1752_v39 }
 0x8a3   :  { %v3494_v10 = vpack.c.bf16 %v3718_v1, %v3717_v22  ;;  %v3841_v50 = vpop.eup %3840 }
 0x8a4   :  { %v3721_v62 = vpop.permute.xlu1 %3720  ;;  %v1764_v20 = vmul.f32 %v3841_v50, %v4660_v2 }
 0x8a5   :  { %v1758_v42 = vpop.xlane.xlu0 %1757  ;;  %v3723_v14 = vunpack.i.h.bf16 %v3721_v62  ;;  %v3722_v0 = vunpack.i.l.bf16 %v3721_v62 }
 0x8a7   :  { %v3498_v35 = vpack.c.bf16 %v3723_v14, %v3722_v0  ;;  %v3892_v14 = vld [vmem:[%s5056_s0 + $0x8] sm:$0xff] }
 0x8a8   :  { %v1035_v3 = vpop.permute.xlu1 %1034  ;;  %v3843_v5 = vpop.eup %3842 }
 0x8a9   :  { %1059 = vst.msk [vmem:[#allocation2] sm:$0xff] %vm1058_vm4, %v1035_v3  ;;  %v1755_v4 = vpop.xlane.xlu0 %1754  ;;  %v3845_v49 = vpop.eup %3844  ;;  %v1766_v58 = vmul.f32 %v3843_v5, %v4666_v16  ;;  %v1979_v16 = vld [vmem:[%s5059_s4 + $0x10] sm:$0xff] }
 0x8aa   :  { %3848 = vrcp.f32 %v1755_v4  ;;  %v1768_v23 = vmul.f32 %v3845_v49, %v4664_v7  ;;  %v3502_v7 = vpack.c.bf16 %v1978_v18, %v1977_v43  ;;  %v3506_v21 = vpack.c.bf16 %v1980_v41, %v1979_v16  ;;  %v3898_v43 = vld [vmem:[%s5056_s0 + $0x30] sm:$0xff] }
 0x8ab   :  { %3850 = vrcp.f32 %v1758_v42 }
 0x8ac   :  { %v1037_v17 = vpop.permute.xlu1 %1036  ;;  %v3847_v54 = vpop.eup %3846 }
 0x8ad   :  { %1060 = vst.msk [vmem:[#allocation2 + $0x8] sm:$0xff] %vm1058_vm4, %v1037_v17  ;;  %v3711_v48 = vpop.permute.xlu0 %3710  ;;  %v1770_v59 = vmul.f32 %v3847_v54, %v4672_v32 }
 0x8ae   :  { %v3713_v44 = vunpack.i.h.bf16 %v3711_v48  ;;  %v3712_v12 = vunpack.i.l.bf16 %v3711_v48 }
 0x8b0   :  { %v3490_v8 = vpack.c.bf16 %v3713_v44, %v3712_v12  ;;  %v1488_v27 = vpop.permute.xlu1 %1487  ;;  %v2795_v12 = vld [vmem:[%s5060_s5] ss:$0 sm:$0xff] }
 0x8b1   :  { %1511 = vst.msk [vmem:[#allocation2 + $0x8] sm:$0xff] %vm1509_vm5, %v1488_v27  ;;  %v1486_v24 = vpop.permute.xlu0 %1485 }
 0x8b2   :  { %1510 = vst.msk [vmem:[#allocation2] sm:$0xff] %vm1509_vm5, %v1486_v24  ;;  %3491 = vmatprep.subr.bf16.mxu1 %v3490_v8 }
 0x8b3   :  { %3493 = vmatpush3.bf16.msra.mxu1 %v3490_v8 }
 0x8b4   :  { %3495 = vmatprep.subr.bf16.mxu1 %v3494_v10  ;;  %v1041_v13 = vpop.permute.xlu1 %1040  ;;  %v3849_v28 = vpop.eup %3848 }
 0x8b5   :  { %1062 = vst.msk [vmem:[#allocation2 + $0x18] sm:$0xff] %vm1058_vm4, %v1041_v13  ;;  %v1039_v11 = vpop.permute.xlu0 %1038  ;;  %v3851_v57 = vpop.eup %3850  ;;  %v1772_v61 = vmul.f32 %v3849_v28, %v4680_v31  ;;  %v3893_v13 = vld [vmem:[%s5056_s0] sm:$0xff] }
 0x8b6   :  { %1061 = vst.msk [vmem:[#allocation2 + $0x10] sm:$0xff] %vm1058_vm4, %v1039_v11  ;;  %v1774_v51 = vmul.f32 %v3851_v57, %v4676_v26 }
 0x8b7   :  { %3497 = vmatpush3.bf16.msra.mxu1 %v3494_v10 }
 0x8b8   :  { %3499 = vmatprep.subr.bf16.mxu1 %v3498_v35  ;;  %v1492_v15 = vpop.permute.xlu1 %1491 }
 0x8b9   :  { %1513 = vst.msk [vmem:[#allocation2 + $0x18] sm:$0xff] %vm1509_vm5, %v1492_v15  ;;  %v1490_v55 = vpop.permute.xlu0 %1489 }
 0x8ba   :  { %1512 = vst.msk [vmem:[#allocation2 + $0x10] sm:$0xff] %vm1509_vm5, %v1490_v55 }
 0x8bb   :  { %3501 = vmatpush3.bf16.msra.mxu1 %v3498_v35 }
 0x8bc   :  { %v1045_v46 = vpop.permute.xlu1 %1044  ;;  %3503 = vmatprep.subr.bf16.mxu1 %v3502_v7 }
 0x8bd   :  { %1064 = vst.msk [vmem:[#allocation2 + $0x28] sm:$0xff] %vm1058_vm4, %v1045_v46  ;;  %v1043_v52 = vpop.permute.xlu0 %1042  ;;  %v3894_v46 = vld [vmem:[%s5056_s0 + $0x10] sm:$0xff] }
 0x8be   :  { %1063 = vst.msk [vmem:[#allocation2 + $0x20] sm:$0xff] %vm1058_vm4, %v1043_v52  ;;  %3239 = vmatmul.mubr.msk.f32.vlgmr.msra.gmra.mrb[16].mxu1 %vm366_vm3, %v1762_v40 }
 0x8bf   :  { %3241 = vmatprep.mubr.msk.f32.mxu1 %vm366_vm3, %v1764_v20  ;;  %3505 = vmatpush3.bf16.msra.mxu1 %v3502_v7  ;;  %v3895_v20 = vld [vmem:[%s5056_s0 + $0x18] sm:$0xff] }
 0x8c0   :  { %v1496_v36 = vpop.permute.xlu1 %1495  ;;  %3507 = vmatprep.subr.bf16.mxu1 %v3506_v21  ;;  %v3899_v7 = vld [vmem:[%s5056_s0 + $0x38] sm:$0xff] }
 0x8c1   :  { %1515 = vst.msk [vmem:[#allocation2 + $0x28] sm:$0xff] %vm1509_vm5, %v1496_v36  ;;  %v1494_v9 = vpop.permute.xlu0 %1493 }
 0x8c2   :  { %1514 = vst.msk [vmem:[#allocation2 + $0x20] sm:$0xff] %vm1509_vm5, %v1494_v9  ;;  %3242 = vmatmul.mubr.msk.f32.gmra.mrb[18].mxu1 %vm366_vm3, %v1766_v58 }
 0x8c3   :  { %3244 = vmatprep.mubr.msk.f32.mxu1 %vm366_vm3, %v1768_v23  ;;  %3509 = vmatpush3.bf16.msra.mxu1 %v3506_v21  ;;  %v3896_v23 = vld [vmem:[%s5056_s0 + $0x20] sm:$0xff] }
 0x8c4   :  { %v1049_v33 = vpop.permute.xlu1 %1048 }
 0x8c5   :  { %1066 = vst.msk [vmem:[#allocation2 + $0x38] sm:$0xff] %vm1058_vm4, %v1049_v33  ;;  %v1047_v45 = vpop.permute.xlu0 %1046 }
 0x8c6   :  { %1065 = vst.msk [vmem:[#allocation2 + $0x30] sm:$0xff] %vm1058_vm4, %v1047_v45  ;;  %3245 = vmatmul.mubr.msk.f32.gmra.mrb[20].mxu1 %vm366_vm3, %v1770_v59  ;;  %v3897_v45 = vld [vmem:[%s5056_s0 + $0x28] sm:$0xff] }
 0x8c7   :  { %3247 = vmatprep.mubr.msk.f32.mxu1 %vm366_vm3, %v1772_v61 }
 0x8c8   :  { %v1500_v2 = vpop.permute.xlu1 %1499 }
 0x8c9   :  { %1517 = vst.msk [vmem:[#allocation2 + $0x38] sm:$0xff] %vm1509_vm5, %v1500_v2  ;;  %v1498_v63 = vpop.permute.xlu0 %1497 }
 0x8ca   :  { %1516 = vst.msk [vmem:[#allocation2 + $0x30] sm:$0xff] %vm1509_vm5, %v1498_v63  ;;  %3248 = vmatmul.mubr.msk.f32.gmra.mrb[22].mxu1 %vm366_vm3, %v1774_v51 }
 0x991   :  { %v3240_v32 = vpop.f32.mrb[16].mxu1 }
 0x992   :  { %1938 = vrot.lane.b32.xlu1 %v3240_v32, %s3913_s20  ;;  %v1889_v47 = vpop.f32.mrb[17].mxu1 }
 0x993   :  { %1936 = vrot.lane.b32.xlu0 %v1889_v47, %s3913_s20 }
 0x995   :  { %v3243_v26 = vpop.f32.mrb[18].mxu1 }
 0x996   :  { %1942 = vrot.lane.b32.xlu1 %v3243_v26, %s3913_s20  ;;  %v1899_v60 = vpop.f32.mrb[19].mxu1 }
 0x997   :  { %1940 = vrot.lane.b32.xlu0 %v1899_v60, %s3913_s20 }
 0x999   :  { %v3246_v31 = vpop.f32.mrb[20].mxu1 }
 0x99a   :  { %1946 = vrot.lane.b32.xlu1 %v3246_v31, %s3913_s20  ;;  %v1909_v6 = vpop.f32.mrb[21].mxu1 }
 0x99b   :  { %1944 = vrot.lane.b32.xlu0 %v1909_v6, %s3913_s20 }
 0x99d   :  { %v3249_v25 = vpop.f32.mrb[22].mxu1 }
 0x99e   :  { %1950 = vrot.lane.b32.xlu1 %v3249_v25, %s3913_s20  ;;  %v1919_v30 = vpop.f32.mrb[23].mxu1 }
 0x99f   :  { %1948 = vrot.lane.b32.xlu0 %v1919_v30, %s3913_s20 }
 0xa04   :  { %v1939_v34 = vpop.permute.xlu1 %1938 }
 0xa05   :  { %1962 = vst.msk [vmem:[#allocation2 + $0x8] sm:$0xff] %vm1960_vm6, %v1939_v34  ;;  %v1937_v38 = vpop.permute.xlu0 %1936 }
 0xa06   :  { %1961 = vst.msk [vmem:[#allocation2] sm:$0xff] %vm1960_vm6, %v1937_v38 }
 0xa08   :  { %v1943_v29 = vpop.permute.xlu1 %1942 }
 0xa09   :  { %1964 = vst.msk [vmem:[#allocation2 + $0x18] sm:$0xff] %vm1960_vm6, %v1943_v29  ;;  %v1941_v37 = vpop.permute.xlu0 %1940 }
 0xa0a   :  { %1963 = vst.msk [vmem:[#allocation2 + $0x10] sm:$0xff] %vm1960_vm6, %v1941_v37 }
 0xa0c   :  { %v1947_v56 = vpop.permute.xlu1 %1946  ;;  %v1970_v62 = vld [vmem:[#allocation2 + $0x8] sm:$0xff] }
 0xa0d   :  { %1966 = vst.msk [vmem:[#allocation2 + $0x28] sm:$0xff] %vm1960_vm6, %v1947_v56  ;;  %v1945_v53 = vpop.permute.xlu0 %1944  ;;  %v1969_v39 = vld [vmem:[#allocation2] sm:$0xff] }
 0xa0e   :  { %1965 = vst.msk [vmem:[#allocation2 + $0x20] sm:$0xff] %vm1960_vm6, %v1945_v53  ;;  %3258 = vmatprep.mubr.msk.f32.mxu1 %vm66_vm0, %v1969_v39 }
 0xa0f   :  { %3259 = vmatmul.mubr.msk.f32.vlgmr.msra.gmra.mrb[24].mxu1 %vm66_vm0, %v1970_v62 }
 0xa10   :  { %v1951_v42 = vpop.permute.xlu1 %1950  ;;  %v1972_v17 = vld [vmem:[#allocation2 + $0x18] sm:$0xff] }
 0xa11   :  { %1968 = vst.msk [vmem:[#allocation2 + $0x38] sm:$0xff] %vm1960_vm6, %v1951_v42  ;;  %v1949_v3 = vpop.permute.xlu0 %1948  ;;  %v1971_v4 = vld [vmem:[#allocation2 + $0x10] sm:$0xff] }
 0xa12   :  { %1967 = vst.msk [vmem:[#allocation2 + $0x30] sm:$0xff] %vm1960_vm6, %v1949_v3  ;;  %3261 = vmatprep.mubr.msk.f32.mxu1 %vm66_vm0, %v1971_v4 }
 0xa13   :  { %3262 = vmatmul.mubr.msk.f32.gmra.mrb[26].mxu1 %vm66_vm0, %v1972_v17 }
 0xa14   :  { %v1974_v1 = vld [vmem:[#allocation2 + $0x28] sm:$0xff] }
 0xa15   :  { %v1973_v48 = vld [vmem:[#allocation2 + $0x20] sm:$0xff] }
 0xa16   :  { %3264 = vmatprep.mubr.msk.f32.mxu1 %vm66_vm0, %v1973_v48 }
 0xa17   :  { %3265 = vmatmul.mubr.msk.f32.gmra.mrb[28].mxu1 %vm66_vm0, %v1974_v1 }
 0xa18   :  { %v1976_v44 = vld [vmem:[#allocation2 + $0x38] sm:$0xff] }
 0xa19   :  { %v1975_v22 = vld [vmem:[#allocation2 + $0x30] sm:$0xff] }
 0xa1a   :  { %3267 = vmatprep.mubr.msk.f32.mxu1 %vm66_vm0, %v1975_v22 }
 0xa1b   :  { %3268 = vmatmul.mubr.msk.f32.gmra.mrb[30].mxu1 %vm66_vm0, %v1976_v44 }
 0xae2   :  { %v3260_v8 = vpop.f32.mrb[24].mxu1 }
 0xae3   :  { %v2084_v27 = vadd.f32 %v3260_v8, %v2795_v12  ;;  %v2078_v24 = vpop.f32.mrb[25].mxu1 }
 0xae4   :  { %v2079_v10 = vadd.f32 %v2795_v12, %v2078_v24 }
 0xae5   :  { %v2118_v0 = vadd.f32 %v3892_v14, %v2084_v27 }
 0xae6   :  { %v2117_v11 = vadd.f32 %v3893_v13, %v2079_v10  ;;  %v3263_v35 = vpop.f32.mrb[26].mxu1 }
 0xae7   :  { %v2094_v15 = vadd.f32 %v3263_v35, %v2795_v12  ;;  %v2088_v19 = vpop.f32.mrb[27].mxu1  ;;  %v2128_v55 = vsel %vm66_vm0, %v2118_v0, 0.0 }
 0xae8   :  { %v2089_v50 = vadd.f32 %v2795_v12, %v2088_v19  ;;  %2129 = vadd.xlane.f32.xlu1 %v2128_v55  ;;  %v2125_v40 = vsel %vm66_vm0, %v2117_v11, 0.0 }
 0xae9   :  { %2126 = vadd.xlane.f32.xlu0 %v2125_v40  ;;  %v2120_v49 = vadd.f32 %v3895_v20, %v2094_v15  ;;  %v2261_v20 = vld [vmem:[%s5061_s8 + $0x8] sm:$0xff] }
 0xaea   :  { %v2119_v5 = vadd.f32 %v3894_v46, %v2089_v50  ;;  %v3266_v52 = vpop.f32.mrb[28].mxu1 }
 0xaeb   :  { %v2098_v36 = vpop.f32.mrb[29].mxu1  ;;  %v2104_v58 = vadd.f32 %v3266_v52, %v2795_v12  ;;  %v2134_v57 = vsel %vm66_vm0, %v2120_v49, 0.0  ;;  %v2260_v52 = vld [vmem:[%s5061_s8] sm:$0xff] }
 0xaec   :  { %v2099_v54 = vadd.f32 %v2795_v12, %v2098_v36  ;;  %v2131_v9 = vsel %vm66_vm0, %v2119_v5, 0.0  ;;  %v2262_v36 = vld [vmem:[%s5061_s8 + $0x10] sm:$0xff] }
 0xaed   :  { %2132 = vadd.xlane.f32.xlu0 %v2131_v9  ;;  %v2122_v61 = vadd.f32 %v3897_v45, %v2104_v58  ;;  %v2263_v58 = vld [vmem:[%s5061_s8 + $0x18] sm:$0xff]  ;;  %v2408_v9 = vld [vmem:[%s5062_s10] sm:$0xff] }
 0xaee   :  { %v2121_v28 = vadd.f32 %v3896_v23, %v2099_v54  ;;  %v3269_v33 = vpop.f32.mrb[30].mxu1  ;;  %v3514_v54 = vpack.c.bf16 %v2263_v58, %v2262_v36  ;;  %v2409_v23 = vld [vmem:[%s5062_s10 + $0x8] sm:$0xff]  ;;  %v2412_v45 = vld [vmem:[%s5062_s10 + $0x20] sm:$0xff] }
 0xaef   :  { %v2108_v59 = vpop.f32.mrb[31].mxu1  ;;  %v2114_v2 = vadd.f32 %v3269_v33, %v2795_v12  ;;  %v2140_v41 = vsel %vm66_vm0, %v2122_v61, 0.0  ;;  %v3518_v33 = vpack.c.bf16 %v2409_v23, %v2408_v9 }
 0xaf0   :  { %v2109_v51 = vadd.f32 %v2795_v12, %v2108_v59  ;;  %v2137_v63 = vsel %vm66_vm0, %v2121_v28, 0.0  ;;  %v2411_v59 = vld [vmem:[%s5062_s10 + $0x18] sm:$0xff] }
 0xaf1   :  { %2138 = vadd.xlane.f32.xlu1 %v2137_v63  ;;  %2135 = vadd.xlane.f32.xlu0 %v2134_v57  ;;  %v2124_v16 = vadd.f32 %v3899_v7, %v2114_v2  ;;  %v2415_v63 = vld [vmem:[%s5062_s10 + $0x38] sm:$0xff]  ;;  %v2417_v7 = vld [vmem:[%s5062_s10 + $0x48] sm:$0xff] }
 0xaf2   :  { %v2123_v18 = vadd.f32 %v3898_v43, %v2109_v51  ;;  %3519 = vmatprep.subr.bf16.mxu1 %v3518_v33  ;;  %v2414_v51 = vld [vmem:[%s5062_s10 + $0x30] sm:$0xff] }
 0xaf3   :  { %v2146_v32 = vsel %vm66_vm0, %v2124_v16, 0.0  ;;  %3521 = vmatpush3.bf16.msra.mxu1 %v3518_v33  ;;  %v3530_v43 = vpack.c.bf16 %v2415_v63, %v2414_v51 }
 0xaf4   :  { %v2143_v21 = vsel %vm66_vm0, %v2123_v18, 0.0 }
 0xaf5   :  { %2141 = vadd.xlane.f32.xlu0 %v2140_v41  ;;  %2144 = vadd.xlane.f32.xlu1 %v2143_v21  ;;  %v2418_v41 = vld [vmem:[%s5062_s10 + $0x50] sm:$0xff]  ;;  %v2419_v21 = vld [vmem:[%s5062_s10 + $0x58] sm:$0xff] }
 0xaf9   :  { %2147 = vadd.xlane.f32.xlu0 %v2146_v32  ;;  %v3538_v32 = vpack.c.bf16 %v2419_v21, %v2418_v41  ;;  %v2422_v21 = vld [vmem:[%s5062_s10 + $0x70] sm:$0xff] }
 0xb75   :  { %v2130_v47 = vpop.xlane.xlu1 %2129 }
 0xb76   :  { %v2151_v26 = vmul.f32 0.03125, %v2130_v47  ;;  %v2127_v60 = vpop.xlane.xlu0 %2126  ;;  %v2420_v47 = vld [vmem:[%s5062_s10 + $0x60] sm:$0xff] }
 0xb77   :  { %v2150_v31 = vmul.f32 0.03125, %v2127_v60 }
 0xb78   :  { %v4801_v6 = vsub.f32 %v2118_v0, %v2151_v26  ;;  %v2421_v26 = vld [vmem:[%s5062_s10 + $0x68] sm:$0xff] }
 0xb79   :  { %v4803_v25 = vsub.f32 %v2117_v11, %v2150_v31  ;;  %v3542_v60 = vpack.c.bf16 %v2421_v26, %v2420_v47  ;;  %v2806_v47 = vld [vmem:[%s5065_s9] ss:$0 sm:$0xff] }
 0xb7a   :  { %v2133_v30 = vpop.xlane.xlu0 %2132  ;;  %v2167_v34 = vmul.f32 %v4801_v6, %v4801_v6 }
 0xb7b   :  { %v2152_v38 = vmul.f32 0.03125, %v2133_v30  ;;  %v2166_v29 = vmul.f32 %v4803_v25, %v4803_v25 }
 0xb7c   :  { %v2177_v37 = vsel %vm66_vm0, %v2167_v34, 0.0 }
 0xb7d   :  { %v4810_v56 = vsub.f32 %v2119_v5, %v2152_v38  ;;  %2178 = vadd.xlane.f32.xlu0 %v2177_v37  ;;  %v2174_v53 = vsel %vm66_vm0, %v2166_v29, 0.0 }
 0xb7e   :  { %v2139_v39 = vpop.xlane.xlu1 %2138  ;;  %v2136_v62 = vpop.xlane.xlu0 %2135  ;;  %2175 = vadd.xlane.f32.xlu1 %v2174_v53 }
 0xb7f   :  { %v2154_v42 = vmul.f32 0.03125, %v2139_v39  ;;  %v2153_v3 = vmul.f32 0.03125, %v2136_v62  ;;  %v2168_v4 = vmul.f32 %v4810_v56, %v4810_v56 }
 0xb81   :  { %v4815_v17 = vsub.f32 %v2121_v28, %v2154_v42  ;;  %v4817_v48 = vsub.f32 %v2120_v49, %v2153_v3  ;;  %v2180_v1 = vsel %vm66_vm0, %v2168_v4, 0.0  ;;  %v3510_v49 = vpack.c.bf16 %v2261_v20, %v2260_v52  ;;  %v2410_v28 = vld [vmem:[%s5062_s10 + $0x10] sm:$0xff] }
 0xb82   :  { %v2142_v22 = vpop.xlane.xlu0 %2141  ;;  %2181 = vadd.xlane.f32.xlu1 %v2180_v1  ;;  %v2145_v44 = vpop.xlane.xlu1 %2144  ;;  %v3522_v57 = vpack.c.bf16 %v2411_v59, %v2410_v28 }
 0xb83   :  { %v2155_v12 = vmul.f32 0.03125, %v2142_v22  ;;  %v2156_v8 = vmul.f32 0.03125, %v2145_v44  ;;  %v2169_v27 = vmul.f32 %v4817_v48, %v4817_v48  ;;  %v2170_v24 = vmul.f32 %v4815_v17, %v4815_v17  ;;  %3511 = vmatprep.subr.bf16.mxu0 %v3510_v49 }
 0xb84   :  { %3513 = vmatpush3.bf16.msra.mxu0 %v3510_v49  ;;  %3523 = vmatprep.subr.bf16.mxu1 %v3522_v57 }
 0xb85   :  { %v4824_v10 = vsub.f32 %v2122_v61, %v2155_v12  ;;  %v4826_v14 = vsub.f32 %v2123_v18, %v2156_v8  ;;  %v2183_v0 = vsel %vm66_vm0, %v2169_v27, 0.0  ;;  %v2186_v13 = vsel %vm66_vm0, %v2170_v24, 0.0  ;;  %3515 = vmatprep.subr.bf16.mxu0 %v3514_v54  ;;  %v2413_v61 = vld [vmem:[%s5062_s10 + $0x28] sm:$0xff]  ;;  %3525 = vmatpush3.bf16.msra.mxu1 %v3522_v57  ;;  %v2416_v18 = vld [vmem:[%s5062_s10 + $0x40] sm:$0xff] }
 0xb86   :  { %2184 = vadd.xlane.f32.xlu0 %v2183_v0  ;;  %v2148_v11 = vpop.xlane.xlu0 %2147  ;;  %2187 = vadd.xlane.f32.xlu1 %v2186_v13  ;;  %v3526_v2 = vpack.c.bf16 %v2413_v61, %v2412_v45  ;;  %v2804_v13 = vld [vmem:[%s5063_s6] ss:$0 sm:$0xff] }
 0xb87   :  { %v2157_v35 = vmul.f32 0.03125, %v2148_v11  ;;  %v2171_v15 = vmul.f32 %v4824_v10, %v4824_v10  ;;  %v2172_v19 = vmul.f32 %v4826_v14, %v4826_v14 }
 0xb88   :  { %3517 = vmatpush3.bf16.msra.mxu0 %v3514_v54  ;;  %3527 = vmatprep.subr.bf16.mxu1 %v3526_v2 }
 0xb89   :  { %v4834_v55 = vsub.f32 %v2124_v16, %v2157_v35  ;;  %v2189_v50 = vsel %vm66_vm0, %v2171_v15, 0.0  ;;  %v2192_v40 = vsel %vm66_vm0, %v2172_v19, 0.0  ;;  %3529 = vmatpush3.bf16.msra.mxu1 %v3526_v2  ;;  %v3534_v16 = vpack.c.bf16 %v2417_v7, %v2416_v18 }
 0xb8a   :  { %2190 = vadd.xlane.f32.xlu0 %v2189_v50  ;;  %2193 = vadd.xlane.f32.xlu1 %v2192_v40 }
 0xb8b   :  { %v2173_v46 = vmul.f32 %v4834_v55, %v4834_v55  ;;  %3531 = vmatprep.subr.bf16.mxu1 %v3530_v43 }
 0xb8d   :  { %v2195_v5 = vsel %vm66_vm0, %v2173_v46, 0.0  ;;  %3533 = vmatpush3.bf16.msra.mxu1 %v3530_v43  ;;  %v2805_v46 = vld [vmem:[%s5064_s7] ss:$0 sm:$0xff] }
 0xb8e   :  { %2196 = vadd.xlane.f32.xlu0 %v2195_v5  ;;  %3535 = vmatprep.subr.bf16.mxu1 %v3534_v16 }
 0xb91   :  { %3537 = vmatpush3.bf16.msra.mxu1 %v3534_v16 }
 0xb92   :  { %3539 = vmatprep.subr.bf16.mxu1 %v3538_v32 }
 0xb95   :  { %3541 = vmatpush3.bf16.msra.mxu1 %v3538_v32 }
 0xb96   :  { %3543 = vmatprep.subr.bf16.mxu1 %v3542_v60 }
 0xb99   :  { %3545 = vmatpush3.bf16.msra.mxu1 %v3542_v60 }
 0xc0a   :  { %v2179_v31 = vpop.xlane.xlu0 %2178 }
 0xc0b   :  { %v2199_v30 = vmul.f32 0.03125, %v2179_v31  ;;  %v2176_v34 = vpop.xlane.xlu1 %2175 }
 0xc0c   :  { %v2198_v38 = vmul.f32 0.03125, %v2176_v34 }
 0xc0d   :  { %v2207_v29 = vadd.f32 1e-05, %v2199_v30 }
 0xc0e   :  { %v2206_v37 = vadd.f32 1e-05, %v2198_v38 }
 0xc0f   :  { %3852 = vrsqrt.f32 %v2207_v29  ;;  %v2182_v53 = vpop.xlane.xlu1 %2181 }
 0xc10   :  { %3854 = vrsqrt.f32 %v2206_v37  ;;  %v2200_v39 = vmul.f32 0.03125, %v2182_v53 }
 0xc12   :  { %v2208_v62 = vadd.f32 1e-05, %v2200_v39 }
 0xc13   :  { %v2185_v42 = vpop.xlane.xlu0 %2184  ;;  %v2188_v3 = vpop.xlane.xlu1 %2187 }
 0xc14   :  { %3856 = vrsqrt.f32 %v2208_v62  ;;  %v2201_v4 = vmul.f32 0.03125, %v2185_v42  ;;  %v2202_v1 = vmul.f32 0.03125, %v2188_v3 }
 0xc16   :  { %v2209_v22 = vadd.f32 1e-05, %v2201_v4  ;;  %v2210_v44 = vadd.f32 1e-05, %v2202_v1 }
 0xc17   :  { %v2191_v12 = vpop.xlane.xlu0 %2190  ;;  %v2194_v8 = vpop.xlane.xlu1 %2193 }
 0xc18   :  { %3858 = vrsqrt.f32 %v2209_v22  ;;  %v2203_v27 = vmul.f32 0.03125, %v2191_v12  ;;  %v2204_v24 = vmul.f32 0.03125, %v2194_v8 }
 0xc19   :  { %v3853_v0 = vpop.eup %3852  ;;  %3860 = vrsqrt.f32 %v2210_v44 }
 0xc1a   :  { %v3855_v11 = vpop.eup %3854  ;;  %v2223_v35 = vmul.f32 %v3853_v0, %v4801_v6  ;;  %v2211_v15 = vadd.f32 1e-05, %v2203_v27  ;;  %v2212_v19 = vadd.f32 1e-05, %v2204_v24 }
 0xc1b   :  { %v2197_v50 = vpop.xlane.xlu0 %2196  ;;  %v2222_v40 = vmul.f32 %v3855_v11, %v4803_v25 }
 0xc1c   :  { %v2238_v5 = vmul.f32 %v2804_v13, %v2223_v35  ;;  %3862 = vrsqrt.f32 %v2211_v15  ;;  %v2205_v52 = vmul.f32 0.03125, %v2197_v50  ;;  %v2815_v35 = vld [vmem:[%s5066_s11] ss:$0 sm:$0xff] }
 0xc1d   :  { %3864 = vrsqrt.f32 %v2212_v19  ;;  %v2237_v20 = vmul.f32 %v2804_v13, %v2222_v40 }
 0xc1e   :  { %v3857_v49 = vpop.eup %3856  ;;  %v2213_v36 = vadd.f32 1e-05, %v2205_v52  ;;  %v4906_v54 = vadd.f32 %v2805_v46, %v2238_v5 }
 0xc1f   :  { %v4903_v58 = vadd.f32 %v2805_v46, %v2237_v20  ;;  %v2224_v6 = vmul.f32 %v3857_v49, %v4810_v56 }
 0xc20   :  { %3866 = vrsqrt.f32 %v2213_v36 }
 0xc21   :  { %3278 = vmatprep.mubr.msk.f32.mxu0 %vm66_vm0, %v4903_v58  ;;  %v2239_v25 = vmul.f32 %v2804_v13, %v2224_v6 }
 0xc22   :  { %v3859_v9 = vpop.eup %3858  ;;  %3279 = vmatmul.mubr.msk.f32.vlgmr.msra.gmra.mrb[48].mxu0 %vm66_vm0, %v4906_v54 }
 0xc23   :  { %v3861_v23 = vpop.eup %3860  ;;  %v4912_v28 = vadd.f32 %v2805_v46, %v2239_v25  ;;  %v2225_v33 = vmul.f32 %v3859_v9, %v4817_v48 }
 0xc24   :  { %v2226_v59 = vmul.f32 %v3861_v23, %v4815_v17 }
 0xc25   :  { %3281 = vmatprep.mubr.msk.f32.mxu0 %vm66_vm0, %v4912_v28  ;;  %v2240_v56 = vmul.f32 %v2804_v13, %v2225_v33 }
 0xc26   :  { %v3863_v57 = vpop.eup %3862  ;;  %v2241_v45 = vmul.f32 %v2804_v13, %v2226_v59 }
 0xc27   :  { %v3865_v61 = vpop.eup %3864  ;;  %v4918_v2 = vadd.f32 %v2805_v46, %v2240_v56  ;;  %v2227_v51 = vmul.f32 %v3863_v57, %v4824_v10 }
 0xc28   :  { %v4921_v63 = vadd.f32 %v2805_v46, %v2241_v45  ;;  %v2228_v43 = vmul.f32 %v3865_v61, %v4826_v14 }
 0xc29   :  { %3282 = vmatmul.mubr.msk.f32.gmra.mrb[50].mxu0 %vm66_vm0, %v4918_v2  ;;  %v2242_v48 = vmul.f32 %v2804_v13, %v2227_v51 }
 0xc2a   :  { %v3867_v17 = vpop.eup %3866  ;;  %3284 = vmatprep.mubr.msk.f32.mxu0 %vm66_vm0, %v4921_v63  ;;  %v2243_v18 = vmul.f32 %v2804_v13, %v2228_v43 }
 0xc2b   :  { %v4928_v7 = vadd.f32 %v2805_v46, %v2242_v48  ;;  %v2229_v16 = vmul.f32 %v3867_v17, %v4834_v55  ;;  %v2423_v55 = vld [vmem:[%s5062_s10 + $0x78] sm:$0xff] }
 0xc2c   :  { %v4931_v41 = vadd.f32 %v2805_v46, %v2243_v18  ;;  %v3546_v32 = vpack.c.bf16 %v2423_v55, %v2422_v21 }
 0xc2d   :  { %3285 = vmatmul.mubr.msk.f32.gmra.mrb[52].mxu0 %vm66_vm0, %v4928_v7  ;;  %v2244_v10 = vmul.f32 %v2804_v13, %v2229_v16 }
 0xc2e   :  { %3287 = vmatprep.mubr.msk.f32.mxu0 %vm66_vm0, %v4931_v41  ;;  %3547 = vmatprep.subr.bf16.mxu1 %v3546_v32 }
 0xc2f   :  { %v4937_v14 = vadd.f32 %v2805_v46, %v2244_v10  ;;  %3549 = vmatpush3.bf16.msra.mxu1 %v3546_v32 }
 0xc31   :  { %3288 = vmatmul.mubr.msk.f32.gmra.mrb[54].mxu0 %vm66_vm0, %v4937_v14 }
 0xcf5   :  { %v3280_v26 = vpop.f32.mrb[48].mxu0 }
 0xcf6   :  { %v2367_v60 = vadd.f32 %v3280_v26, %v2806_v47  ;;  %v2361_v31 = vpop.f32.mrb[49].mxu0 }
 0xcf7   :  { %v2362_v30 = vadd.f32 %v2806_v47, %v2361_v31 }
 0xcf8   :  { %v2401_v38 = vmax.f32 %v2367_v60, 0.0 }
 0xcf9   :  { %v2400_v34 = vmax.f32 %v2362_v30, 0.0 }
 0xcfb   :  { %3322 = vmatprep.mubr.f32.mxu1 %v2400_v34 }
 0xcfc   :  { %v3283_v29 = vpop.f32.mrb[50].mxu0  ;;  %3323 = vmatmul.mubr.f32.vlgmr.msra.gmra.mrb[32].mxu1 %v2401_v38 }
 0xcfd   :  { %v2377_v37 = vadd.f32 %v3283_v29, %v2806_v47  ;;  %v2371_v53 = vpop.f32.mrb[51].mxu0 }
 0xcfe   :  { %v2372_v39 = vadd.f32 %v2806_v47, %v2371_v53 }
 0xcff   :  { %v2403_v3 = vmax.f32 %v2377_v37, 0.0 }
 0xd00   :  { %v2402_v62 = vmax.f32 %v2372_v39, 0.0  ;;  %v3286_v42 = vpop.f32.mrb[52].mxu0 }
 0xd01   :  { %v2387_v4 = vadd.f32 %v3286_v42, %v2806_v47  ;;  %v2381_v1 = vpop.f32.mrb[53].mxu0 }
 0xd02   :  { %v2382_v22 = vadd.f32 %v2806_v47, %v2381_v1  ;;  %3325 = vmatprep.mubr.f32.mxu1 %v2402_v62 }
 0xd03   :  { %3326 = vmatmul.mubr.f32.gmra.mrb[34].mxu1 %v2403_v3  ;;  %v2405_v8 = vmax.f32 %v2387_v4, 0.0 }
 0xd04   :  { %v2404_v44 = vmax.f32 %v2382_v22, 0.0  ;;  %v3289_v12 = vpop.f32.mrb[54].mxu0 }
 0xd05   :  { %v2397_v27 = vadd.f32 %v3289_v12, %v2806_v47  ;;  %v2391_v24 = vpop.f32.mrb[55].mxu0 }
 0xd06   :  { %v2392_v0 = vadd.f32 %v2806_v47, %v2391_v24  ;;  %3328 = vmatprep.mubr.f32.mxu1 %v2404_v44 }
 0xd07   :  { %3329 = vmatmul.mubr.f32.gmra.mrb[36].mxu1 %v2405_v8  ;;  %v2407_v11 = vmax.f32 %v2397_v27, 0.0 }
 0xd08   :  { %v2406_v13 = vmax.f32 %v2392_v0, 0.0 }
 0xd0a   :  { %3331 = vmatprep.mubr.f32.mxu1 %v2406_v13 }
 0xd0b   :  { %3332 = vmatmul.mubr.f32.gmra.mrb[38].mxu1 %v2407_v11 }
 0xdcf   :  { %v3324_v15 = vpop.f32.mrb[32].mxu1 }
 0xdd0   :  { %v2503_v19 = vadd.f32 %v3324_v15, %v2815_v35  ;;  %v2497_v50 = vpop.f32.mrb[33].mxu1 }
 0xdd1   :  { %v2498_v40 = vadd.f32 %v2815_v35, %v2497_v50 }
 0xdd2   :  { %v2537_v46 = vadd.f32 %v2503_v19, %v4906_v54 }
 0xdd3   :  { %v2536_v5 = vadd.f32 %v2498_v40, %v4903_v58 }
 0xdd4   :  { %v2547_v52 = vsel %vm66_vm0, %v2537_v46, 0.0 }
 0xdd5   :  { %2548 = vadd.xlane.f32.xlu0 %v2547_v52  ;;  %v2544_v20 = vsel %vm66_vm0, %v2536_v5, 0.0 }
 0xdd6   :  { %2545 = vadd.xlane.f32.xlu1 %v2544_v20  ;;  %v3327_v49 = vpop.f32.mrb[34].mxu1 }
 0xdd7   :  { %v2513_v36 = vadd.f32 %v3327_v49, %v2815_v35  ;;  %v2507_v6 = vpop.f32.mrb[35].mxu1 }
 0xdd8   :  { %v2508_v25 = vadd.f32 %v2815_v35, %v2507_v6 }
 0xdd9   :  { %v2539_v9 = vadd.f32 %v2513_v36, %v4918_v2 }
 0xdda   :  { %v2538_v23 = vadd.f32 %v2508_v25, %v4912_v28  ;;  %v3330_v33 = vpop.f32.mrb[36].mxu1 }
 0xddb   :  { %v2523_v59 = vadd.f32 %v3330_v33, %v2815_v35  ;;  %v2517_v56 = vpop.f32.mrb[37].mxu1  ;;  %v2553_v54 = vsel %vm66_vm0, %v2539_v9, 0.0 }
 0xddc   :  { %v2518_v58 = vadd.f32 %v2815_v35, %v2517_v56  ;;  %2554 = vadd.xlane.f32.xlu0 %v2553_v54  ;;  %v2550_v57 = vsel %vm66_vm0, %v2538_v23, 0.0 }
 0xddd   :  { %v2541_v45 = vadd.f32 %v2523_v59, %v4928_v7  ;;  %2551 = vadd.xlane.f32.xlu1 %v2550_v57 }
 0xdde   :  { %v2540_v61 = vadd.f32 %v2518_v58, %v4921_v63  ;;  %v3333_v51 = vpop.f32.mrb[38].mxu1 }
 0xddf   :  { %v2533_v43 = vadd.f32 %v3333_v51, %v2815_v35  ;;  %v2527_v48 = vpop.f32.mrb[39].mxu1  ;;  %v2559_v2 = vsel %vm66_vm0, %v2541_v45, 0.0 }
 0xde0   :  { %v2528_v28 = vadd.f32 %v2815_v35, %v2527_v48  ;;  %2560 = vadd.xlane.f32.xlu0 %v2559_v2  ;;  %v2556_v17 = vsel %vm66_vm0, %v2540_v61, 0.0 }
 0xde1   :  { %v2543_v18 = vadd.f32 %v2533_v43, %v4937_v14  ;;  %2557 = vadd.xlane.f32.xlu1 %v2556_v17 }
 0xde2   :  { %v2542_v16 = vadd.f32 %v2528_v28, %v4931_v41  ;;  %v2816_v28 = vld [vmem:[%s5067_s12] ss:$0 sm:$0xff] }
 0xde3   :  { %v2565_v10 = vsel %vm66_vm0, %v2543_v18, 0.0 }
 0xde4   :  { %2566 = vadd.xlane.f32.xlu0 %v2565_v10  ;;  %v2562_v7 = vsel %vm66_vm0, %v2542_v16, 0.0 }
 0xde5   :  { %2563 = vadd.xlane.f32.xlu1 %v2562_v7 }
 0xe62   :  { %v2549_v63 = vpop.xlane.xlu0 %2548 }
 0xe63   :  { %v2569_v21 = vmul.f32 0.03125, %v2549_v63  ;;  %v2546_v55 = vpop.xlane.xlu1 %2545 }
 0xe64   :  { %v2568_v32 = vmul.f32 0.03125, %v2546_v55 }
 0xe65   :  { %v4969_v47 = vsub.f32 %v2537_v46, %v2569_v21  ;;  %v2817_v21 = vld [vmem:[%s5068_s13] ss:$0 sm:$0xff] }
 0xe66   :  { %v4971_v26 = vsub.f32 %v2536_v5, %v2568_v32 }
 0xe67   :  { %v2585_v14 = vmul.f32 %v4969_v47, %v4969_v47 }
 0xe68   :  { %v2584_v41 = vmul.f32 %v4971_v26, %v4971_v26 }
 0xe69   :  { %v2555_v60 = vpop.xlane.xlu0 %2554  ;;  %v2595_v31 = vsel %vm66_vm0, %v2585_v14, 0.0 }
 0xe6a   :  { %v2571_v30 = vmul.f32 0.03125, %v2555_v60  ;;  %2596 = vadd.xlane.f32.xlu0 %v2595_v31  ;;  %v2552_v34 = vpop.xlane.xlu1 %2551  ;;  %v2592_v38 = vsel %vm66_vm0, %v2584_v41, 0.0 }
 0xe6b   :  { %v2570_v29 = vmul.f32 0.03125, %v2552_v34  ;;  %2593 = vadd.xlane.f32.xlu1 %v2592_v38 }
 0xe6c   :  { %v4979_v37 = vsub.f32 %v2539_v9, %v2571_v30 }
 0xe6d   :  { %v4981_v53 = vsub.f32 %v2538_v23, %v2570_v29  ;;  %v2561_v39 = vpop.xlane.xlu0 %2560 }
 0xe6e   :  { %v2573_v62 = vmul.f32 0.03125, %v2561_v39  ;;  %v2558_v42 = vpop.xlane.xlu1 %2557  ;;  %v2587_v3 = vmul.f32 %v4979_v37, %v4979_v37 }
 0xe6f   :  { %v2572_v4 = vmul.f32 0.03125, %v2558_v42  ;;  %v2586_v1 = vmul.f32 %v4981_v53, %v4981_v53 }
 0xe70   :  { %v4987_v22 = vsub.f32 %v2541_v45, %v2573_v62  ;;  %v2601_v44 = vsel %vm66_vm0, %v2587_v3, 0.0 }
 0xe71   :  { %v4990_v12 = vsub.f32 %v2540_v61, %v2572_v4  ;;  %2602 = vadd.xlane.f32.xlu0 %v2601_v44  ;;  %v2567_v8 = vpop.xlane.xlu0 %2566  ;;  %v2598_v27 = vsel %vm66_vm0, %v2586_v1, 0.0 }
 0xe72   :  { %v2575_v24 = vmul.f32 0.03125, %v2567_v8  ;;  %2599 = vadd.xlane.f32.xlu1 %v2598_v27  ;;  %v2564_v0 = vpop.xlane.xlu1 %2563  ;;  %v2589_v13 = vmul.f32 %v4987_v22, %v4987_v22 }
 0xe73   :  { %v2574_v11 = vmul.f32 0.03125, %v2564_v0  ;;  %v2588_v35 = vmul.f32 %v4990_v12, %v4990_v12 }
 0xe74   :  { %v4997_v15 = vsub.f32 %v2543_v18, %v2575_v24  ;;  %v2607_v19 = vsel %vm66_vm0, %v2589_v13, 0.0 }
 0xe75   :  { %v5000_v50 = vsub.f32 %v2542_v16, %v2574_v11  ;;  %2608 = vadd.xlane.f32.xlu0 %v2607_v19  ;;  %v2604_v40 = vsel %vm66_vm0, %v2588_v35, 0.0 }
 0xe76   :  { %2605 = vadd.xlane.f32.xlu1 %v2604_v40  ;;  %v2591_v46 = vmul.f32 %v4997_v15, %v4997_v15 }
 0xe77   :  { %v2590_v5 = vmul.f32 %v5000_v50, %v5000_v50 }
 0xe78   :  { %v2613_v52 = vsel %vm66_vm0, %v2591_v46, 0.0 }
 0xe79   :  { %2614 = vadd.xlane.f32.xlu0 %v2613_v52  ;;  %v2610_v20 = vsel %vm66_vm0, %v2590_v5, 0.0 }
 0xe7a   :  { %2611 = vadd.xlane.f32.xlu1 %v2610_v20 }
 0xef7   :  { %v2597_v49 = vpop.xlane.xlu0 %2596 }
 0xef8   :  { %v2617_v36 = vmul.f32 0.03125, %v2597_v49  ;;  %v2594_v6 = vpop.xlane.xlu1 %2593 }
 0xef9   :  { %v2616_v25 = vmul.f32 0.03125, %v2594_v6 }
 0xefa   :  { %v2625_v9 = vadd.f32 1e-05, %v2617_v36 }
 0xefb   :  { %v2624_v23 = vadd.f32 1e-05, %v2616_v25 }
 0xefc   :  { %3868 = vrsqrt.f32 %v2625_v9 }
 0xefd   :  { %3870 = vrsqrt.f32 %v2624_v23 }
 0xefe   :  { %v2603_v33 = vpop.xlane.xlu0 %2602 }
 0xeff   :  { %v2619_v59 = vmul.f32 0.03125, %v2603_v33  ;;  %v2600_v56 = vpop.xlane.xlu1 %2599 }
 0xf00   :  { %v2618_v54 = vmul.f32 0.03125, %v2600_v56 }
 0xf01   :  { %v2627_v58 = vadd.f32 1e-05, %v2619_v59 }
 0xf02   :  { %v2626_v57 = vadd.f32 1e-05, %v2618_v54  ;;  %v2609_v45 = vpop.xlane.xlu0 %2608 }
 0xf03   :  { %3872 = vrsqrt.f32 %v2627_v58  ;;  %v2621_v61 = vmul.f32 0.03125, %v2609_v45  ;;  %v2606_v51 = vpop.xlane.xlu1 %2605 }
 0xf04   :  { %3874 = vrsqrt.f32 %v2626_v57  ;;  %v2620_v43 = vmul.f32 0.03125, %v2606_v51 }
 0xf05   :  { %v2629_v48 = vadd.f32 1e-05, %v2621_v61 }
 0xf06   :  { %v3869_v2 = vpop.eup %3868  ;;  %v2628_v17 = vadd.f32 1e-05, %v2620_v43  ;;  %v2615_v18 = vpop.xlane.xlu0 %2614 }
 0xf07   :  { %v3871_v16 = vpop.eup %3870  ;;  %v2641_v10 = vmul.f32 %v3869_v2, %v4969_v47  ;;  %3876 = vrsqrt.f32 %v2629_v48  ;;  %v2623_v7 = vmul.f32 0.03125, %v2615_v18  ;;  %v2612_v63 = vpop.xlane.xlu1 %2611 }
 0xf08   :  { %v2640_v55 = vmul.f32 %v3871_v16, %v4971_v26  ;;  %3878 = vrsqrt.f32 %v2628_v17  ;;  %v2622_v32 = vmul.f32 0.03125, %v2612_v63 }
 0xf09   :  { %v2656_v14 = vmul.f32 %v2816_v28, %v2641_v10  ;;  %v2631_v41 = vadd.f32 1e-05, %v2623_v7 }
 0xf0a   :  { %v2655_v60 = vmul.f32 %v2816_v28, %v2640_v55  ;;  %v2630_v31 = vadd.f32 1e-05, %v2622_v32 }
 0xf0b   :  { %v2671_v30 = vadd.f32 %v2817_v21, %v2656_v14  ;;  %3880 = vrsqrt.f32 %v2631_v41 }
 0xf0c   :  { %v2670_v34 = vadd.f32 %v2817_v21, %v2655_v60  ;;  %3882 = vrsqrt.f32 %v2630_v31 }
 0xf0d   :  { %v3873_v47 = vpop.eup %3872  ;;  %2679 = vst.msk [vmem:[%s5069_s14 + $0x8] sm:$0xff] %vm66_vm0, %v2671_v30 }
 0xf0e   :  { %v3875_v38 = vpop.eup %3874  ;;  %2678 = vst.msk [vmem:[%s5069_s14] sm:$0xff] %vm66_vm0, %v2670_v34  ;;  %v2643_v26 = vmul.f32 %v3873_v47, %v4979_v37 }
 0xf0f   :  { %v2642_v29 = vmul.f32 %v3875_v38, %v4981_v53 }
 0xf10   :  { %v2658_v39 = vmul.f32 %v2816_v28, %v2643_v26 }
 0xf11   :  { %v3877_v62 = vpop.eup %3876  ;;  %v2657_v42 = vmul.f32 %v2816_v28, %v2642_v29 }
 0xf12   :  { %v3879_v3 = vpop.eup %3878  ;;  %v2673_v4 = vadd.f32 %v2817_v21, %v2658_v39  ;;  %v2645_v1 = vmul.f32 %v3877_v62, %v4987_v22 }
 0xf13   :  { %v2672_v44 = vadd.f32 %v2817_v21, %v2657_v42  ;;  %v2644_v8 = vmul.f32 %v3879_v3, %v4990_v12 }
 0xf14   :  { %2681 = vst.msk [vmem:[%s5069_s14 + $0x18] sm:$0xff] %vm66_vm0, %v2673_v4  ;;  %v2660_v27 = vmul.f32 %v2816_v28, %v2645_v1 }
 0xf15   :  { %v3881_v24 = vpop.eup %3880  ;;  %2680 = vst.msk [vmem:[%s5069_s14 + $0x10] sm:$0xff] %vm66_vm0, %v2672_v44  ;;  %v2659_v37 = vmul.f32 %v2816_v28, %v2644_v8 }
 0xf16   :  { %v3883_v53 = vpop.eup %3882  ;;  %v2675_v0 = vadd.f32 %v2817_v21, %v2660_v27  ;;  %v2647_v22 = vmul.f32 %v3881_v24, %v4997_v15 }
 0xf17   :  { %v2674_v13 = vadd.f32 %v2817_v21, %v2659_v37  ;;  %v2646_v12 = vmul.f32 %v3883_v53, %v5000_v50 }
 0xf18   :  { %2683 = vst.msk [vmem:[%s5069_s14 + $0x28] sm:$0xff] %vm66_vm0, %v2675_v0  ;;  %v2662_v11 = vmul.f32 %v2816_v28, %v2647_v22 }
 0xf19   :  { %2682 = vst.msk [vmem:[%s5069_s14 + $0x20] sm:$0xff] %vm66_vm0, %v2674_v13  ;;  %v2661_v35 = vmul.f32 %v2816_v28, %v2646_v12 }
 0xf1a   :  { %v2677_v19 = vadd.f32 %v2817_v21, %v2662_v11 }
 0xf1b   :  { %v2676_v40 = vadd.f32 %v2817_v21, %v2661_v35 }
 0xf1c   :  { %2685 = vst.msk [vmem:[%s5069_s14 + $0x38] sm:$0xff] %vm66_vm0, %v2677_v19 }
 0xf1d   :  { %2684 = vst.msk [vmem:[%s5069_s14 + $0x30] sm:$0xff] %vm66_vm0, %v2676_v40 }

</bundles_post_ra>
